<compile_context>
chip_gen: v7x
topology: tpu7x:2x2x1
jax: 0.10.0
libtpu: 0.0.40
codegen_flags: <defaults>
</compile_context>

<pallas_src>
import math
import functools

import jax
import jax.numpy as jnp
import numpy as np
from jax import lax
from jax.experimental import pallas as pl
from jax.experimental.pallas import tpu as pltpu


def _mha_kernel(q_ref, k_ref, v_ref, keep_ref, w_ref, b_ref, out_ref, *,
                num_heads, size_head, batch_tile, seq_len):
    f32 = jnp.float32
    bf16 = jnp.bfloat16

    # Packed biases: row 0..3 = bq (pre-scaled), bk, bv, bo.
    b_all = b_ref[...]                       # (4, H) f32
    bq = b_all[0:1, :]
    bk = b_all[1:2, :]
    bv = b_all[2:3, :]
    bo = b_all[3:4, :]

    # Fused input projections over all Bt*S rows of this grid step
    # (bf16 operands, f32 accumulation; score scale already folded into Wq/bq).
    qp = jnp.dot(q_ref[...], w_ref[0], preferred_element_type=f32) + bq
    kp = jnp.dot(k_ref[...], w_ref[1], preferred_element_type=f32) + bk
    vp = jnp.dot(v_ref[...], w_ref[2], preferred_element_type=f32) + bv
    wo = w_ref[3]                            # (H, H) bf16 output projection

    # Query-row masking, hoisted out of the batch/head loops: zeroed query
    # rows -> all-zero score rows -> uniform softmax, identical to the
    # reference's masked_fill(mask == 0, -1e9) over whole query rows.
    qp = qp * keep_ref[...]                  # (rows, H) * (rows, 1)

    qp_bf = qp.astype(bf16)
    kp_bf = kp.astype(bf16)
    vp_bf = vp.astype(bf16)

    # Static unroll over the (small) batch-tile and head counts; with
    # dh < 128 the per-head lane slices are cheap and a fori_loop buys nothing.
    for b in range(batch_tile):
        r0 = b * seq_len
        r1 = r0 + seq_len
        qb = qp_bf[r0:r1, :]                 # (S, H) bf16
        kb = kp_bf[r0:r1, :]
        vb = vp_bf[r0:r1, :]

        out_rows = None
        for h in range(num_heads):
            lo = h * size_head
            hi = lo + size_head
            # q @ k^T contracting the last dims (no explicit .T relayout).
            scores = lax.dot_general(qb[:, lo:hi], kb[:, lo:hi],
                                     (((1,), (1,)), ((), ())),
                                     preferred_element_type=f32)   # (S, S) f32

            m = jnp.max(scores, axis=-1, keepdims=True)
            e = jnp.exp(scores - m)
            denom = jnp.sum(e, axis=-1, keepdims=True)
            probs = e * pl.reciprocal(denom, approx=True)          # EUP slot

            head_out = jnp.dot(probs.astype(bf16), vb[:, lo:hi],
                               preferred_element_type=f32)         # (S, dh)
            # Register-accumulated output projection: no context scratch, no
            # dh-lane partial stores.
            contrib = jnp.dot(head_out.astype(bf16), wo[lo:hi, :],
                              preferred_element_type=f32)          # (S, H)
            out_rows = contrib if out_rows is None else out_rows + contrib

        out_ref[r0:r1, :] = (out_rows + bo).astype(out_ref.dtype)


def multi_headed_attention(q, k, v, mask, params, *, num_heads,
                           batch_tile=None, out_dtype=None):
    """q, k, v: (B, S, H) float; mask: (B, S, 1) float (0 = masked query row)."""
    B, S, H = q.shape
    assert H % num_heads == 0
    size_head = H // num_heads
    scale = 1.0 / math.sqrt(size_head)
    if out_dtype is None:
        out_dtype = q.dtype

    (wq, bq), (wk, bk), (wv, bv), (wo, bo) = params
    # Pre-transpose weights so the kernel computes x @ W; fold the score scale
    # into the query projection; pack into single operands; cast MXU operands
    # to bf16.
    w_all = jnp.stack([wq.T * scale, wk.T, wv.T, wo.T], axis=0).astype(jnp.bfloat16)
    b_all = jnp.stack([bq * scale, bk, bv, bo], axis=0).astype(jnp.float32)

    # Batch-tile heuristic: target >= ~128 rows per grid step for MXU M-dim
    # utilisation, but keep >= 2 grid steps when B >= 2 so the "parallel"
    # batch axis shards across both v7x TensorCores.
    if batch_tile is None:
        bt = max(1, min(B, -(-128 // S)))
        if B >= 2:
            bt = max(1, min(bt, B // 2))
        while B % bt != 0:
            bt -= 1
        batch_tile = bt
    assert B % batch_tile == 0
    rows = batch_tile * S

    q2 = q.reshape(B * S, H).astype(jnp.bfloat16)
    k2 = k.reshape(B * S, H).astype(jnp.bfloat16)
    v2 = v.reshape(B * S, H).astype(jnp.bfloat16)
    keep = (mask != 0.0).astype(jnp.float32).reshape(B * S, 1)

    kernel = functools.partial(_mha_kernel, num_heads=num_heads,
                               size_head=size_head, batch_tile=batch_tile,
                               seq_len=S)

    row_spec = pl.BlockSpec((rows, H), lambda i: (i, 0))
    keep_spec = pl.BlockSpec((rows, 1), lambda i: (i, 0))
    weight_spec = pl.BlockSpec((4, H, H), lambda i: (0, 0, 0))
    bias_spec = pl.BlockSpec((4, H), lambda i: (0, 0))

    out = pl.pallas_call(
        kernel,
        out_shape=jax.ShapeDtypeStruct((B * S, H), out_dtype),
        grid_spec=pltpu.PrefetchScalarGridSpec(
            num_scalar_prefetch=0,
            grid=(B // batch_tile,),
            in_specs=[row_spec, row_spec, row_spec, keep_spec,
                      weight_spec, bias_spec],
            out_specs=row_spec,
        ),
        compiler_params=pltpu.CompilerParams(
            dimension_semantics=("parallel",)),
    )(q2, k2, v2, keep, w_all, b_all)
    return out.reshape(B, S, H)


def _reference(q, k, v, mask, params, num_heads):
    """Pure-JAX reference mirroring the PyTorch forward (eval mode)."""
    B, S, H = q.shape
    dh = H // num_heads
    (wq, bq), (wk, bk), (wv, bv), (wo, bo) = params

    def proj(x, w, b):
        y = x @ w.T + b
        return y.reshape(B, S, num_heads, dh).transpose(0, 2, 1, 3)  # (B, h, S, dh)

    qh, kh, vh = proj(q, wq, bq), proj(k, wk, bk), proj(v, wv, bv)
    corr = jnp.einsum("bhqd,bhkd->bhqk", qh, kh) / math.sqrt(dh)
    m = mask[:, None, :, :]                                  # (B, 1, S, 1)
    corr = jnp.where(m == 0.0, -1.0e9, corr)
    prob = jax.nn.softmax(corr, axis=-1)
    hidden = jnp.einsum("bhqk,bhkd->bhqd", prob, vh)
    hidden = hidden.transpose(0, 2, 1, 3).reshape(B, S, H)
    return hidden @ wo.T + bo


if __name__ == "__main__":
    B, S, H, heads = 4, 8, 32, 4

    key = jax.random.PRNGKey(0)
    ks = jax.random.split(key, 12)

    # Deterministic parameter init (shapes match nn.Linear(H, H) x4).
    def linear_init(kw, kb):
        bound = 1.0 / math.sqrt(H)
        w = jax.random.uniform(kw, (H, H), jnp.float32, -bound, bound)
        b = jax.random.uniform(kb, (H,), jnp.float32, -bound, bound)
        return w, b

    wq, bq = linear_init(ks[0], ks[1])
    wk, bk = linear_init(ks[2], ks[3])
    wv, bv = linear_init(ks[4], ks[5])
    # w_layer: xavier_normal_ weight, default-init bias.
    xavier_std = math.sqrt(2.0 / (H + H))
    wo = jax.random.normal(ks[6], (H, H), jnp.float32) * xavier_std
    bo = jax.random.uniform(ks[7], (H,), jnp.float32,
                            -1.0 / math.sqrt(H), 1.0 / math.sqrt(H))
    params = ((wq, bq), (wk, bk), (wv, bv), (wo, bo))

    q = jax.random.normal(ks[8], (B, S, H), jnp.float32)
    k = jax.random.normal(ks[9], (B, S, H), jnp.float32)
    v = jax.random.normal(ks[10], (B, S, H), jnp.float32)

    # Mask: mostly ones; mask out the last query position of batch 1 and the
    # first query position of batch 3 (whole-row query masking, as in the
    # PyTorch broadcast).
    mask = jnp.ones((B, S, 1), jnp.float32)
    mask = mask.at[1, S - 1, 0].set(0.0)
    mask = mask.at[3, 0, 0].set(0.0)

    out = multi_headed_attention(q, k, v, mask, params, num_heads=heads)
    out = jax.block_until_ready(out)

    ref = _reference(q, k, v, mask, params, heads)
    # bf16 MXU operands + approx reciprocal -> slightly looser tolerance.
    np.testing.assert_allclose(np.asarray(out), np.asarray(ref),
                               rtol=3e-2, atol=3e-2)

    print("KERNEL_OK")
</pallas_src>

<mosaic_0001>
module attributes {stable_mosaic.version = 11 : i64} {
  func.func @_mha_kernel(%arg0: i32, %arg1: memref<16x32xbf16, #tpu.memory_space<vmem>>, %arg2: memref<16x32xbf16, #tpu.memory_space<vmem>>, %arg3: memref<16x32xbf16, #tpu.memory_space<vmem>>, %arg4: memref<16x1xf32, #tpu.memory_space<vmem>>, %arg5: memref<4x32x32xbf16, #tpu.memory_space<vmem>>, %arg6: memref<4x32xf32, #tpu.memory_space<vmem>>, %arg7: memref<16x32xf32, #tpu.memory_space<vmem>>) attributes {dimension_semantics = [#tpu.dimension_semantics<parallel>], iteration_bounds = array<i64: 2>, scalar_prefetch = 0 : i64, scratch_operands = 0 : i64, tpu.core_type = #tpu.core_type<tc>, window_params = [{transform_indices = @transform_0, window_bounds = array<i64: 16, 32>}, {transform_indices = @transform_1, window_bounds = array<i64: 16, 32>}, {transform_indices = @transform_2, window_bounds = array<i64: 16, 32>}, {transform_indices = @transform_3, window_bounds = array<i64: 16, 1>}, {pipeline_mode = #tpu.pipeline_mode<synchronous>, transform_indices = @transform_4, window_bounds = array<i64: 4, 32, 32>}, {pipeline_mode = #tpu.pipeline_mode<synchronous>, transform_indices = @transform_5, window_bounds = array<i64: 4, 32>}, {transform_indices = @transform_6, window_bounds = array<i64: 16, 32>}]} {
    %c0 = arith.constant 0 : index
    %c0_0 = arith.constant 0 : index
    %0 = vector.load %arg6[%c0, %c0_0] : memref<4x32xf32, #tpu.memory_space<vmem>>, vector<4x32xf32>
    %1 = vector.extract_strided_slice %0 {offsets = [0, 0], sizes = [1, 32], strides = [1, 1]} : vector<4x32xf32> to vector<1x32xf32>
    %2 = vector.extract_strided_slice %0 {offsets = [1, 0], sizes = [1, 32], strides = [1, 1]} : vector<4x32xf32> to vector<1x32xf32>
    %3 = vector.extract_strided_slice %0 {offsets = [2, 0], sizes = [1, 32], strides = [1, 1]} : vector<4x32xf32> to vector<1x32xf32>
    %4 = vector.extract_strided_slice %0 {offsets = [3, 0], sizes = [1, 32], strides = [1, 1]} : vector<4x32xf32> to vector<1x32xf32>
    %c0_1 = arith.constant 0 : index
    %c0_2 = arith.constant 0 : index
    %5 = vector.load %arg1[%c0_1, %c0_2] : memref<16x32xbf16, #tpu.memory_space<vmem>>, vector<16x32xbf16>
    %c0_3 = arith.constant 0 : index
    %c0_4 = arith.constant 0 : index
    %c0_5 = arith.constant 0 : index
    %6 = vector.load %arg5[%c0_3, %c0_4, %c0_5] : memref<4x32x32xbf16, #tpu.memory_space<vmem>>, vector<1x32x32xbf16>
    %7 = vector.shape_cast %6 : vector<1x32x32xbf16> to vector<32x32xbf16>
    %cst = arith.constant dense<0.000000e+00> : vector<16x32xf32>
    %8 = tpu.matmul %5, %7, %cst {dimension_numbers = #tpu.dot_dimension_numbers<[1], [0], [0], [1], [0, 0, 1, 1], [], []>} : vector<16x32xbf16>, vector<32x32xbf16>, vector<16x32xf32> -> vector<16x32xf32>
    %9 = vector.broadcast %1 : vector<1x32xf32> to vector<16x32xf32>
    %10 = arith.addf %8, %9 : vector<16x32xf32>
    %c0_6 = arith.constant 0 : index
    %c0_7 = arith.constant 0 : index
    %11 = vector.load %arg2[%c0_6, %c0_7] : memref<16x32xbf16, #tpu.memory_space<vmem>>, vector<16x32xbf16>
    %c1 = arith.constant 1 : index
    %c0_8 = arith.constant 0 : index
    %c0_9 = arith.constant 0 : index
    %12 = vector.load %arg5[%c1, %c0_8, %c0_9] : memref<4x32x32xbf16, #tpu.memory_space<vmem>>, vector<1x32x32xbf16>
    %13 = vector.shape_cast %12 : vector<1x32x32xbf16> to vector<32x32xbf16>
    %cst_10 = arith.constant dense<0.000000e+00> : vector<16x32xf32>
    %14 = tpu.matmul %11, %13, %cst_10 {dimension_numbers = #tpu.dot_dimension_numbers<[1], [0], [0], [1], [0, 0, 1, 1], [], []>} : vector<16x32xbf16>, vector<32x32xbf16>, vector<16x32xf32> -> vector<16x32xf32>
    %15 = vector.broadcast %2 : vector<1x32xf32> to vector<16x32xf32>
    %16 = arith.addf %14, %15 : vector<16x32xf32>
    %c0_11 = arith.constant 0 : index
    %c0_12 = arith.constant 0 : index
    %17 = vector.load %arg3[%c0_11, %c0_12] : memref<16x32xbf16, #tpu.memory_space<vmem>>, vector<16x32xbf16>
    %c2 = arith.constant 2 : index
    %c0_13 = arith.constant 0 : index
    %c0_14 = arith.constant 0 : index
    %18 = vector.load %arg5[%c2, %c0_13, %c0_14] : memref<4x32x32xbf16, #tpu.memory_space<vmem>>, vector<1x32x32xbf16>
    %19 = vector.shape_cast %18 : vector<1x32x32xbf16> to vector<32x32xbf16>
    %cst_15 = arith.constant dense<0.000000e+00> : vector<16x32xf32>
    %20 = tpu.matmul %17, %19, %cst_15 {dimension_numbers = #tpu.dot_dimension_numbers<[1], [0], [0], [1], [0, 0, 1, 1], [], []>} : vector<16x32xbf16>, vector<32x32xbf16>, vector<16x32xf32> -> vector<16x32xf32>
    %21 = vector.broadcast %3 : vector<1x32xf32> to vector<16x32xf32>
    %22 = arith.addf %20, %21 : vector<16x32xf32>
    %c3 = arith.constant 3 : index
    %c0_16 = arith.constant 0 : index
    %c0_17 = arith.constant 0 : index
    %23 = vector.load %arg5[%c3, %c0_16, %c0_17] : memref<4x32x32xbf16, #tpu.memory_space<vmem>>, vector<1x32x32xbf16>
    %24 = vector.shape_cast %23 : vector<1x32x32xbf16> to vector<32x32xbf16>
    %c0_18 = arith.constant 0 : index
    %c0_19 = arith.constant 0 : index
    %25 = vector.load %arg4[%c0_18, %c0_19] : memref<16x1xf32, #tpu.memory_space<vmem>>, vector<16x1xf32>
    %26 = vector.broadcast %25 : vector<16x1xf32> to vector<16x32xf32>
    %27 = arith.mulf %10, %26 : vector<16x32xf32>
    %28 = arith.truncf %27 : vector<16x32xf32> to vector<16x32xbf16>
    %29 = arith.truncf %16 : vector<16x32xf32> to vector<16x32xbf16>
    %30 = arith.truncf %22 : vector<16x32xf32> to vector<16x32xbf16>
    %31 = vector.extract_strided_slice %28 {offsets = [0, 0], sizes = [8, 32], strides = [1, 1]} : vector<16x32xbf16> to vector<8x32xbf16>
    %32 = vector.extract_strided_slice %29 {offsets = [0, 0], sizes = [8, 32], strides = [1, 1]} : vector<16x32xbf16> to vector<8x32xbf16>
    %33 = vector.extract_strided_slice %30 {offsets = [0, 0], sizes = [8, 32], strides = [1, 1]} : vector<16x32xbf16> to vector<8x32xbf16>
    %34 = vector.extract_strided_slice %31 {offsets = [0, 0], sizes = [8, 8], strides = [1, 1]} : vector<8x32xbf16> to vector<8x8xbf16>
    %35 = vector.extract_strided_slice %32 {offsets = [0, 0], sizes = [8, 8], strides = [1, 1]} : vector<8x32xbf16> to vector<8x8xbf16>
    %cst_20 = arith.constant dense<0.000000e+00> : vector<8x8xf32>
    %36 = tpu.matmul %34, %35, %cst_20 {dimension_numbers = #tpu.dot_dimension_numbers<[1], [1], [0], [0], [0, 0, 1, 0], [], []>} : vector<8x8xbf16>, vector<8x8xbf16>, vector<8x8xf32> -> vector<8x8xf32>
    %cst_21 = arith.constant dense<0xFF800000> : vector<8xf32>
    %37 = vector.multi_reduction <maximumf>, %36, %cst_21 [1] : vector<8x8xf32> to vector<8xf32>
    %38 = vector.shape_cast %37 : vector<8xf32> to vector<8x1xf32>
    %39 = vector.broadcast %38 : vector<8x1xf32> to vector<8x8xf32>
    %40 = arith.subf %36, %39 : vector<8x8xf32>
    %41 = math.exp %40 : vector<8x8xf32>
    %cst_22 = arith.constant dense<0.000000e+00> : vector<8xf32>
    %42 = vector.multi_reduction <add>, %41, %cst_22 [1] : vector<8x8xf32> to vector<8xf32>
    %43 = vector.shape_cast %42 : vector<8xf32> to vector<8x1xf32>
    %44 = tpu.reciprocal %43 {approx = true} : vector<8x1xf32> -> vector<8x1xf32>
    %45 = vector.broadcast %44 : vector<8x1xf32> to vector<8x8xf32>
    %46 = arith.mulf %41, %45 : vector<8x8xf32>
    %47 = arith.truncf %46 : vector<8x8xf32> to vector<8x8xbf16>
    %48 = vector.extract_strided_slice %33 {offsets = [0, 0], sizes = [8, 8], strides = [1, 1]} : vector<8x32xbf16> to vector<8x8xbf16>
    %cst_23 = arith.constant dense<0.000000e+00> : vector<8x8xf32>
    %49 = tpu.matmul %47, %48, %cst_23 {dimension_numbers = #tpu.dot_dimension_numbers<[1], [0], [0], [1], [0, 0, 1, 1], [], []>} : vector<8x8xbf16>, vector<8x8xbf16>, vector<8x8xf32> -> vector<8x8xf32>
    %50 = arith.truncf %49 : vector<8x8xf32> to vector<8x8xbf16>
    %51 = vector.extract_strided_slice %24 {offsets = [0, 0], sizes = [8, 32], strides = [1, 1]} : vector<32x32xbf16> to vector<8x32xbf16>
    %cst_24 = arith.constant dense<0.000000e+00> : vector<8x32xf32>
    %52 = tpu.matmul %50, %51, %cst_24 {dimension_numbers = #tpu.dot_dimension_numbers<[1], [0], [0], [1], [0, 0, 1, 1], [], []>} : vector<8x8xbf16>, vector<8x32xbf16>, vector<8x32xf32> -> vector<8x32xf32>
    %53 = vector.extract_strided_slice %31 {offsets = [0, 8], sizes = [8, 8], strides = [1, 1]} : vector<8x32xbf16> to vector<8x8xbf16>
    %54 = vector.extract_strided_slice %32 {offsets = [0, 8], sizes = [8, 8], strides = [1, 1]} : vector<8x32xbf16> to vector<8x8xbf16>
    %cst_25 = arith.constant dense<0.000000e+00> : vector<8x8xf32>
    %55 = tpu.matmul %53, %54, %cst_25 {dimension_numbers = #tpu.dot_dimension_numbers<[1], [1], [0], [0], [0, 0, 1, 0], [], []>} : vector<8x8xbf16>, vector<8x8xbf16>, vector<8x8xf32> -> vector<8x8xf32>
    %cst_26 = arith.constant dense<0xFF800000> : vector<8xf32>
    %56 = vector.multi_reduction <maximumf>, %55, %cst_26 [1] : vector<8x8xf32> to vector<8xf32>
    %57 = vector.shape_cast %56 : vector<8xf32> to vector<8x1xf32>
    %58 = vector.broadcast %57 : vector<8x1xf32> to vector<8x8xf32>
    %59 = arith.subf %55, %58 : vector<8x8xf32>
    %60 = math.exp %59 : vector<8x8xf32>
    %cst_27 = arith.constant dense<0.000000e+00> : vector<8xf32>
    %61 = vector.multi_reduction <add>, %60, %cst_27 [1] : vector<8x8xf32> to vector<8xf32>
    %62 = vector.shape_cast %61 : vector<8xf32> to vector<8x1xf32>
    %63 = tpu.reciprocal %62 {approx = true} : vector<8x1xf32> -> vector<8x1xf32>
    %64 = vector.broadcast %63 : vector<8x1xf32> to vector<8x8xf32>
    %65 = arith.mulf %60, %64 : vector<8x8xf32>
    %66 = arith.truncf %65 : vector<8x8xf32> to vector<8x8xbf16>
    %67 = vector.extract_strided_slice %33 {offsets = [0, 8], sizes = [8, 8], strides = [1, 1]} : vector<8x32xbf16> to vector<8x8xbf16>
    %cst_28 = arith.constant dense<0.000000e+00> : vector<8x8xf32>
    %68 = tpu.matmul %66, %67, %cst_28 {dimension_numbers = #tpu.dot_dimension_numbers<[1], [0], [0], [1], [0, 0, 1, 1], [], []>} : vector<8x8xbf16>, vector<8x8xbf16>, vector<8x8xf32> -> vector<8x8xf32>
    %69 = arith.truncf %68 : vector<8x8xf32> to vector<8x8xbf16>
    %70 = vector.extract_strided_slice %24 {offsets = [8, 0], sizes = [8, 32], strides = [1, 1]} : vector<32x32xbf16> to vector<8x32xbf16>
    %cst_29 = arith.constant dense<0.000000e+00> : vector<8x32xf32>
    %71 = tpu.matmul %69, %70, %cst_29 {dimension_numbers = #tpu.dot_dimension_numbers<[1], [0], [0], [1], [0, 0, 1, 1], [], []>} : vector<8x8xbf16>, vector<8x32xbf16>, vector<8x32xf32> -> vector<8x32xf32>
    %72 = arith.addf %52, %71 : vector<8x32xf32>
    %73 = vector.extract_strided_slice %31 {offsets = [0, 16], sizes = [8, 8], strides = [1, 1]} : vector<8x32xbf16> to vector<8x8xbf16>
    %74 = vector.extract_strided_slice %32 {offsets = [0, 16], sizes = [8, 8], strides = [1, 1]} : vector<8x32xbf16> to vector<8x8xbf16>
    %cst_30 = arith.constant dense<0.000000e+00> : vector<8x8xf32>
    %75 = tpu.matmul %73, %74, %cst_30 {dimension_numbers = #tpu.dot_dimension_numbers<[1], [1], [0], [0], [0, 0, 1, 0], [], []>} : vector<8x8xbf16>, vector<8x8xbf16>, vector<8x8xf32> -> vector<8x8xf32>
    %cst_31 = arith.constant dense<0xFF800000> : vector<8xf32>
    %76 = vector.multi_reduction <maximumf>, %75, %cst_31 [1] : vector<8x8xf32> to vector<8xf32>
    %77 = vector.shape_cast %76 : vector<8xf32> to vector<8x1xf32>
    %78 = vector.broadcast %77 : vector<8x1xf32> to vector<8x8xf32>
    %79 = arith.subf %75, %78 : vector<8x8xf32>
    %80 = math.exp %79 : vector<8x8xf32>
    %cst_32 = arith.constant dense<0.000000e+00> : vector<8xf32>
    %81 = vector.multi_reduction <add>, %80, %cst_32 [1] : vector<8x8xf32> to vector<8xf32>
    %82 = vector.shape_cast %81 : vector<8xf32> to vector<8x1xf32>
    %83 = tpu.reciprocal %82 {approx = true} : vector<8x1xf32> -> vector<8x1xf32>
    %84 = vector.broadcast %83 : vector<8x1xf32> to vector<8x8xf32>
    %85 = arith.mulf %80, %84 : vector<8x8xf32>
    %86 = arith.truncf %85 : vector<8x8xf32> to vector<8x8xbf16>
    %87 = vector.extract_strided_slice %33 {offsets = [0, 16], sizes = [8, 8], strides = [1, 1]} : vector<8x32xbf16> to vector<8x8xbf16>
    %cst_33 = arith.constant dense<0.000000e+00> : vector<8x8xf32>
    %88 = tpu.matmul %86, %87, %cst_33 {dimension_numbers = #tpu.dot_dimension_numbers<[1], [0], [0], [1], [0, 0, 1, 1], [], []>} : vector<8x8xbf16>, vector<8x8xbf16>, vector<8x8xf32> -> vector<8x8xf32>
    %89 = arith.truncf %88 : vector<8x8xf32> to vector<8x8xbf16>
    %90 = vector.extract_strided_slice %24 {offsets = [16, 0], sizes = [8, 32], strides = [1, 1]} : vector<32x32xbf16> to vector<8x32xbf16>
    %cst_34 = arith.constant dense<0.000000e+00> : vector<8x32xf32>
    %91 = tpu.matmul %89, %90, %cst_34 {dimension_numbers = #tpu.dot_dimension_numbers<[1], [0], [0], [1], [0, 0, 1, 1], [], []>} : vector<8x8xbf16>, vector<8x32xbf16>, vector<8x32xf32> -> vector<8x32xf32>
    %92 = arith.addf %72, %91 : vector<8x32xf32>
    %93 = vector.extract_strided_slice %31 {offsets = [0, 24], sizes = [8, 8], strides = [1, 1]} : vector<8x32xbf16> to vector<8x8xbf16>
    %94 = vector.extract_strided_slice %32 {offsets = [0, 24], sizes = [8, 8], strides = [1, 1]} : vector<8x32xbf16> to vector<8x8xbf16>
    %cst_35 = arith.constant dense<0.000000e+00> : vector<8x8xf32>
    %95 = tpu.matmul %93, %94, %cst_35 {dimension_numbers = #tpu.dot_dimension_numbers<[1], [1], [0], [0], [0, 0, 1, 0], [], []>} : vector<8x8xbf16>, vector<8x8xbf16>, vector<8x8xf32> -> vector<8x8xf32>
    %cst_36 = arith.constant dense<0xFF800000> : vector<8xf32>
    %96 = vector.multi_reduction <maximumf>, %95, %cst_36 [1] : vector<8x8xf32> to vector<8xf32>
    %97 = vector.shape_cast %96 : vector<8xf32> to vector<8x1xf32>
    %98 = vector.broadcast %97 : vector<8x1xf32> to vector<8x8xf32>
    %99 = arith.subf %95, %98 : vector<8x8xf32>
    %100 = math.exp %99 : vector<8x8xf32>
    %cst_37 = arith.constant dense<0.000000e+00> : vector<8xf32>
    %101 = vector.multi_reduction <add>, %100, %cst_37 [1] : vector<8x8xf32> to vector<8xf32>
    %102 = vector.shape_cast %101 : vector<8xf32> to vector<8x1xf32>
    %103 = tpu.reciprocal %102 {approx = true} : vector<8x1xf32> -> vector<8x1xf32>
    %104 = vector.broadcast %103 : vector<8x1xf32> to vector<8x8xf32>
    %105 = arith.mulf %100, %104 : vector<8x8xf32>
    %106 = arith.truncf %105 : vector<8x8xf32> to vector<8x8xbf16>
    %107 = vector.extract_strided_slice %33 {offsets = [0, 24], sizes = [8, 8], strides = [1, 1]} : vector<8x32xbf16> to vector<8x8xbf16>
    %cst_38 = arith.constant dense<0.000000e+00> : vector<8x8xf32>
    %108 = tpu.matmul %106, %107, %cst_38 {dimension_numbers = #tpu.dot_dimension_numbers<[1], [0], [0], [1], [0, 0, 1, 1], [], []>} : vector<8x8xbf16>, vector<8x8xbf16>, vector<8x8xf32> -> vector<8x8xf32>
    %109 = arith.truncf %108 : vector<8x8xf32> to vector<8x8xbf16>
    %110 = vector.extract_strided_slice %24 {offsets = [24, 0], sizes = [8, 32], strides = [1, 1]} : vector<32x32xbf16> to vector<8x32xbf16>
    %cst_39 = arith.constant dense<0.000000e+00> : vector<8x32xf32>
    %111 = tpu.matmul %109, %110, %cst_39 {dimension_numbers = #tpu.dot_dimension_numbers<[1], [0], [0], [1], [0, 0, 1, 1], [], []>} : vector<8x8xbf16>, vector<8x32xbf16>, vector<8x32xf32> -> vector<8x32xf32>
    %112 = arith.addf %92, %111 : vector<8x32xf32>
    %113 = vector.broadcast %4 : vector<1x32xf32> to vector<8x32xf32>
    %114 = arith.addf %112, %113 : vector<8x32xf32>
    %c0_40 = arith.constant 0 : index
    %c0_41 = arith.constant 0 : index
    %115 = vector.load %arg7[%c0_40, %c0_41] : memref<16x32xf32, #tpu.memory_space<vmem>>, vector<8x32xf32>
    tpu.vector_store %arg7[%c0_40, %c0_41], %114 {strides = array<i32>} : memref<16x32xf32, #tpu.memory_space<vmem>>, vector<8x32xf32>,
    %116 = vector.extract_strided_slice %28 {offsets = [8, 0], sizes = [8, 32], strides = [1, 1]} : vector<16x32xbf16> to vector<8x32xbf16>
    %117 = vector.extract_strided_slice %29 {offsets = [8, 0], sizes = [8, 32], strides = [1, 1]} : vector<16x32xbf16> to vector<8x32xbf16>
    %118 = vector.extract_strided_slice %30 {offsets = [8, 0], sizes = [8, 32], strides = [1, 1]} : vector<16x32xbf16> to vector<8x32xbf16>
    %119 = vector.extract_strided_slice %116 {offsets = [0, 0], sizes = [8, 8], strides = [1, 1]} : vector<8x32xbf16> to vector<8x8xbf16>
    %120 = vector.extract_strided_slice %117 {offsets = [0, 0], sizes = [8, 8], strides = [1, 1]} : vector<8x32xbf16> to vector<8x8xbf16>
    %cst_42 = arith.constant dense<0.000000e+00> : vector<8x8xf32>
    %121 = tpu.matmul %119, %120, %cst_42 {dimension_numbers = #tpu.dot_dimension_numbers<[1], [1], [0], [0], [0, 0, 1, 0], [], []>} : vector<8x8xbf16>, vector<8x8xbf16>, vector<8x8xf32> -> vector<8x8xf32>
    %cst_43 = arith.constant dense<0xFF800000> : vector<8xf32>
    %122 = vector.multi_reduction <maximumf>, %121, %cst_43 [1] : vector<8x8xf32> to vector<8xf32>
    %123 = vector.shape_cast %122 : vector<8xf32> to vector<8x1xf32>
    %124 = vector.broadcast %123 : vector<8x1xf32> to vector<8x8xf32>
    %125 = arith.subf %121, %124 : vector<8x8xf32>
    %126 = math.exp %125 : vector<8x8xf32>
    %cst_44 = arith.constant dense<0.000000e+00> : vector<8xf32>
    %127 = vector.multi_reduction <add>, %126, %cst_44 [1] : vector<8x8xf32> to vector<8xf32>
    %128 = vector.shape_cast %127 : vector<8xf32> to vector<8x1xf32>
    %129 = tpu.reciprocal %128 {approx = true} : vector<8x1xf32> -> vector<8x1xf32>
    %130 = vector.broadcast %129 : vector<8x1xf32> to vector<8x8xf32>
    %131 = arith.mulf %126, %130 : vector<8x8xf32>
    %132 = arith.truncf %131 : vector<8x8xf32> to vector<8x8xbf16>
    %133 = vector.extract_strided_slice %118 {offsets = [0, 0], sizes = [8, 8], strides = [1, 1]} : vector<8x32xbf16> to vector<8x8xbf16>
    %cst_45 = arith.constant dense<0.000000e+00> : vector<8x8xf32>
    %134 = tpu.matmul %132, %133, %cst_45 {dimension_numbers = #tpu.dot_dimension_numbers<[1], [0], [0], [1], [0, 0, 1, 1], [], []>} : vector<8x8xbf16>, vector<8x8xbf16>, vector<8x8xf32> -> vector<8x8xf32>
    %135 = arith.truncf %134 : vector<8x8xf32> to vector<8x8xbf16>
    %136 = vector.extract_strided_slice %24 {offsets = [0, 0], sizes = [8, 32], strides = [1, 1]} : vector<32x32xbf16> to vector<8x32xbf16>
    %cst_46 = arith.constant dense<0.000000e+00> : vector<8x32xf32>
    %137 = tpu.matmul %135, %136, %cst_46 {dimension_numbers = #tpu.dot_dimension_numbers<[1], [0], [0], [1], [0, 0, 1, 1], [], []>} : vector<8x8xbf16>, vector<8x32xbf16>, vector<8x32xf32> -> vector<8x32xf32>
    %138 = vector.extract_strided_slice %116 {offsets = [0, 8], sizes = [8, 8], strides = [1, 1]} : vector<8x32xbf16> to vector<8x8xbf16>
    %139 = vector.extract_strided_slice %117 {offsets = [0, 8], sizes = [8, 8], strides = [1, 1]} : vector<8x32xbf16> to vector<8x8xbf16>
    %cst_47 = arith.constant dense<0.000000e+00> : vector<8x8xf32>
    %140 = tpu.matmul %138, %139, %cst_47 {dimension_numbers = #tpu.dot_dimension_numbers<[1], [1], [0], [0], [0, 0, 1, 0], [], []>} : vector<8x8xbf16>, vector<8x8xbf16>, vector<8x8xf32> -> vector<8x8xf32>
    %cst_48 = arith.constant dense<0xFF800000> : vector<8xf32>
    %141 = vector.multi_reduction <maximumf>, %140, %cst_48 [1] : vector<8x8xf32> to vector<8xf32>
    %142 = vector.shape_cast %141 : vector<8xf32> to vector<8x1xf32>
    %143 = vector.broadcast %142 : vector<8x1xf32> to vector<8x8xf32>
    %144 = arith.subf %140, %143 : vector<8x8xf32>
    %145 = math.exp %144 : vector<8x8xf32>
    %cst_49 = arith.constant dense<0.000000e+00> : vector<8xf32>
    %146 = vector.multi_reduction <add>, %145, %cst_49 [1] : vector<8x8xf32> to vector<8xf32>
    %147 = vector.shape_cast %146 : vector<8xf32> to vector<8x1xf32>
    %148 = tpu.reciprocal %147 {approx = true} : vector<8x1xf32> -> vector<8x1xf32>
    %149 = vector.broadcast %148 : vector<8x1xf32> to vector<8x8xf32>
    %150 = arith.mulf %145, %149 : vector<8x8xf32>
    %151 = arith.truncf %150 : vector<8x8xf32> to vector<8x8xbf16>
    %152 = vector.extract_strided_slice %118 {offsets = [0, 8], sizes = [8, 8], strides = [1, 1]} : vector<8x32xbf16> to vector<8x8xbf16>
    %cst_50 = arith.constant dense<0.000000e+00> : vector<8x8xf32>
    %153 = tpu.matmul %151, %152, %cst_50 {dimension_numbers = #tpu.dot_dimension_numbers<[1], [0], [0], [1], [0, 0, 1, 1], [], []>} : vector<8x8xbf16>, vector<8x8xbf16>, vector<8x8xf32> -> vector<8x8xf32>
    %154 = arith.truncf %153 : vector<8x8xf32> to vector<8x8xbf16>
    %155 = vector.extract_strided_slice %24 {offsets = [8, 0], sizes = [8, 32], strides = [1, 1]} : vector<32x32xbf16> to vector<8x32xbf16>
    %cst_51 = arith.constant dense<0.000000e+00> : vector<8x32xf32>
    %156 = tpu.matmul %154, %155, %cst_51 {dimension_numbers = #tpu.dot_dimension_numbers<[1], [0], [0], [1], [0, 0, 1, 1], [], []>} : vector<8x8xbf16>, vector<8x32xbf16>, vector<8x32xf32> -> vector<8x32xf32>
    %157 = arith.addf %137, %156 : vector<8x32xf32>
    %158 = vector.extract_strided_slice %116 {offsets = [0, 16], sizes = [8, 8], strides = [1, 1]} : vector<8x32xbf16> to vector<8x8xbf16>
    %159 = vector.extract_strided_slice %117 {offsets = [0, 16], sizes = [8, 8], strides = [1, 1]} : vector<8x32xbf16> to vector<8x8xbf16>
    %cst_52 = arith.constant dense<0.000000e+00> : vector<8x8xf32>
    %160 = tpu.matmul %158, %159, %cst_52 {dimension_numbers = #tpu.dot_dimension_numbers<[1], [1], [0], [0], [0, 0, 1, 0], [], []>} : vector<8x8xbf16>, vector<8x8xbf16>, vector<8x8xf32> -> vector<8x8xf32>
    %cst_53 = arith.constant dense<0xFF800000> : vector<8xf32>
    %161 = vector.multi_reduction <maximumf>, %160, %cst_53 [1] : vector<8x8xf32> to vector<8xf32>
    %162 = vector.shape_cast %161 : vector<8xf32> to vector<8x1xf32>
    %163 = vector.broadcast %162 : vector<8x1xf32> to vector<8x8xf32>
    %164 = arith.subf %160, %163 : vector<8x8xf32>
    %165 = math.exp %164 : vector<8x8xf32>
    %cst_54 = arith.constant dense<0.000000e+00> : vector<8xf32>
    %166 = vector.multi_reduction <add>, %165, %cst_54 [1] : vector<8x8xf32> to vector<8xf32>
    %167 = vector.shape_cast %166 : vector<8xf32> to vector<8x1xf32>
    %168 = tpu.reciprocal %167 {approx = true} : vector<8x1xf32> -> vector<8x1xf32>
    %169 = vector.broadcast %168 : vector<8x1xf32> to vector<8x8xf32>
    %170 = arith.mulf %165, %169 : vector<8x8xf32>
    %171 = arith.truncf %170 : vector<8x8xf32> to vector<8x8xbf16>
    %172 = vector.extract_strided_slice %118 {offsets = [0, 16], sizes = [8, 8], strides = [1, 1]} : vector<8x32xbf16> to vector<8x8xbf16>
    %cst_55 = arith.constant dense<0.000000e+00> : vector<8x8xf32>
    %173 = tpu.matmul %171, %172, %cst_55 {dimension_numbers = #tpu.dot_dimension_numbers<[1], [0], [0], [1], [0, 0, 1, 1], [], []>} : vector<8x8xbf16>, vector<8x8xbf16>, vector<8x8xf32> -> vector<8x8xf32>
    %174 = arith.truncf %173 : vector<8x8xf32> to vector<8x8xbf16>
    %175 = vector.extract_strided_slice %24 {offsets = [16, 0], sizes = [8, 32], strides = [1, 1]} : vector<32x32xbf16> to vector<8x32xbf16>
    %cst_56 = arith.constant dense<0.000000e+00> : vector<8x32xf32>
    %176 = tpu.matmul %174, %175, %cst_56 {dimension_numbers = #tpu.dot_dimension_numbers<[1], [0], [0], [1], [0, 0, 1, 1], [], []>} : vector<8x8xbf16>, vector<8x32xbf16>, vector<8x32xf32> -> vector<8x32xf32>
    %177 = arith.addf %157, %176 : vector<8x32xf32>
    %178 = vector.extract_strided_slice %116 {offsets = [0, 24], sizes = [8, 8], strides = [1, 1]} : vector<8x32xbf16> to vector<8x8xbf16>
    %179 = vector.extract_strided_slice %117 {offsets = [0, 24], sizes = [8, 8], strides = [1, 1]} : vector<8x32xbf16> to vector<8x8xbf16>
    %cst_57 = arith.constant dense<0.000000e+00> : vector<8x8xf32>
    %180 = tpu.matmul %178, %179, %cst_57 {dimension_numbers = #tpu.dot_dimension_numbers<[1], [1], [0], [0], [0, 0, 1, 0], [], []>} : vector<8x8xbf16>, vector<8x8xbf16>, vector<8x8xf32> -> vector<8x8xf32>
    %cst_58 = arith.constant dense<0xFF800000> : vector<8xf32>
    %181 = vector.multi_reduction <maximumf>, %180, %cst_58 [1] : vector<8x8xf32> to vector<8xf32>
    %182 = vector.shape_cast %181 : vector<8xf32> to vector<8x1xf32>
    %183 = vector.broadcast %182 : vector<8x1xf32> to vector<8x8xf32>
    %184 = arith.subf %180, %183 : vector<8x8xf32>
    %185 = math.exp %184 : vector<8x8xf32>
    %cst_59 = arith.constant dense<0.000000e+00> : vector<8xf32>
    %186 = vector.multi_reduction <add>, %185, %cst_59 [1] : vector<8x8xf32> to vector<8xf32>
    %187 = vector.shape_cast %186 : vector<8xf32> to vector<8x1xf32>
    %188 = tpu.reciprocal %187 {approx = true} : vector<8x1xf32> -> vector<8x1xf32>
    %189 = vector.broadcast %188 : vector<8x1xf32> to vector<8x8xf32>
    %190 = arith.mulf %185, %189 : vector<8x8xf32>
    %191 = arith.truncf %190 : vector<8x8xf32> to vector<8x8xbf16>
    %192 = vector.extract_strided_slice %118 {offsets = [0, 24], sizes = [8, 8], strides = [1, 1]} : vector<8x32xbf16> to vector<8x8xbf16>
    %cst_60 = arith.constant dense<0.000000e+00> : vector<8x8xf32>
    %193 = tpu.matmul %191, %192, %cst_60 {dimension_numbers = #tpu.dot_dimension_numbers<[1], [0], [0], [1], [0, 0, 1, 1], [], []>} : vector<8x8xbf16>, vector<8x8xbf16>, vector<8x8xf32> -> vector<8x8xf32>
    %194 = arith.truncf %193 : vector<8x8xf32> to vector<8x8xbf16>
    %195 = vector.extract_strided_slice %24 {offsets = [24, 0], sizes = [8, 32], strides = [1, 1]} : vector<32x32xbf16> to vector<8x32xbf16>
    %cst_61 = arith.constant dense<0.000000e+00> : vector<8x32xf32>
    %196 = tpu.matmul %194, %195, %cst_61 {dimension_numbers = #tpu.dot_dimension_numbers<[1], [0], [0], [1], [0, 0, 1, 1], [], []>} : vector<8x8xbf16>, vector<8x32xbf16>, vector<8x32xf32> -> vector<8x32xf32>
    %197 = arith.addf %177, %196 : vector<8x32xf32>
    %198 = vector.broadcast %4 : vector<1x32xf32> to vector<8x32xf32>
    %199 = arith.addf %197, %198 : vector<8x32xf32>
    %c8 = arith.constant 8 : index
    %c0_62 = arith.constant 0 : index
    %200 = vector.load %arg7[%c8, %c0_62] : memref<16x32xf32, #tpu.memory_space<vmem>>, vector<8x32xf32>
    tpu.vector_store %arg7[%c8, %c0_62], %199 {strides = array<i32>} : memref<16x32xf32, #tpu.memory_space<vmem>>, vector<8x32xf32>,
    return
  }
  func.func @transform_0(%arg0: i32) -> (i32, i32) {
    %c0_i32 = arith.constant 0 : i32
    %c0_i32_0 = arith.constant 0 : i32
    return %arg0, %c0_i32 : i32, i32
  }
  func.func @transform_1(%arg0: i32) -> (i32, i32) {
    %c0_i32 = arith.constant 0 : i32
    %c0_i32_0 = arith.constant 0 : i32
    return %arg0, %c0_i32 : i32, i32
  }
  func.func @transform_2(%arg0: i32) -> (i32, i32) {
    %c0_i32 = arith.constant 0 : i32
    %c0_i32_0 = arith.constant 0 : i32
    return %arg0, %c0_i32 : i32, i32
  }
  func.func @transform_3(%arg0: i32) -> (i32, i32) {
    %c0_i32 = arith.constant 0 : i32
    %c0_i32_0 = arith.constant 0 : i32
    return %arg0, %c0_i32 : i32, i32
  }
  func.func @transform_4(%arg0: i32) -> (i32, i32, i32) {
    %c0_i32 = arith.constant 0 : i32
    %c0_i32_0 = arith.constant 0 : i32
    %c0_i32_1 = arith.constant 0 : i32
    %c0_i32_2 = arith.constant 0 : i32
    return %c0_i32, %c0_i32_0, %c0_i32_1 : i32, i32, i32
  }
  func.func @transform_5(%arg0: i32) -> (i32, i32) {
    %c0_i32 = arith.constant 0 : i32
    %c0_i32_0 = arith.constant 0 : i32
    %c0_i32_1 = arith.constant 0 : i32
    return %c0_i32, %c0_i32_0 : i32, i32
  }
  func.func @transform_6(%arg0: i32) -> (i32, i32) {
    %c0_i32 = arith.constant 0 : i32
    %c0_i32_0 = arith.constant 0 : i32
    return %arg0, %c0_i32 : i32, i32
  }
}

</mosaic_0001>

<bundles_post_ra>
// kernel: tpu_custom_call.1
= control target key start
LH: loop header
LB: loop body
LE: loop exit
PB: predicated region body
PF: predicated region fallthrough
CT: control target
= control target key end

     0   :  { %11 = vsyncpa [#allocation3], 0  ;;  %s3023_s0 = inlined_call_operand.vmem [shape: bf16[32,32], index: 0, kind: input, shape index: {}]   ;;  %s3024_s1 = inlined_call_operand.vmem [shape: bf16[32,32], index: 1, kind: input, shape index: {}]   ;;  %s3025_s2 = inlined_call_operand.hbm [shape: bf16[32,32], index: 2, kind: input, shape index: {}]   ;;  %s3026_s3 = inlined_call_operand.vmem [shape: f32[32,1], index: 3, kind: input, shape index: {}]   ;;  %s3027_s4 = inlined_call_operand.hbm [shape: bf16[4,32,32], index: 4, kind: input, shape index: {}]   ;;  %s3028_s5 = inlined_call_operand.vmem [shape: f32[4,32], index: 5, kind: input, shape index: {}]   ;;  %s3029_s6 = inlined_call_operand.hbm [shape: f32[32,32], index: 6, kind: output, shape index: {}]  }
   0x1   :  { %13 = vsyncpa [#allocation3 + $0x1], 0 }
   0x2   :  { %14 = vsyncpa [#allocation6], 0 }
   0x3   :  { %15 = vsyncpa [#allocation4], 0 }
   0x4   :  { %17 = vsyncpa [#allocation4 + $0x1], 0  ;;  %s2550_s21 = smov 0   ;;  %s2552_s22 = smov 0  }
   0x5   :  { %s2554_s23 = smov 0   ;;  %s2556_s24 = smov 0  }
   0x6 LB: > { %s2571_s25 = sadd.s32 4294967295, %s2500_s24   ;;  %s1978_s26 = sadd.s32 4294967294, %s2500_s24   ;;  %s2500_s24 = sphi %s2556_s24, %s3049_s24   ;;  %s2496_s23 = sphi %s2554_s23, %s3048_s23   ;;  %s2492_s22 = sphi %s2552_s22, %s3047_s22   ;;  %s2488_s21 = sphi %s2550_s21, %s3046_s21  }
   0x7   : > { %p95_p0 = scmp.ne.s32.totalorder %s2492_s22, %s2488_s21  ;;  %p3030_p1 = scmp.eq.s32.totalorder %s2571_s25, 0 }
   0x8   : > { %p193_p3 = scmp.eq.s32.totalorder %s1978_s26, 1  ;;  %p1979_p5 = scmp.ge.s32.totalorder %s2500_s24, 1 }
   0x9   : > { %p2580_p4 = por %p3030_p1, %p95_p0  ;;  %p200_p7 = scmp.lt.s32.totalorder %s2500_s24, 3 }
   0xa   : > { %p2585_p6 = por %p193_p3, %p95_p0  ;;  %s2502_s30 = smov [#allocation5]  }
   0xb   : > { %s3033_s27 = scalar_select %p2580_p4, 1, 0 }
   0xc   : > { %s3034_s28 = scalar_select %p2585_p6, 1, 0 }
   0xd   : > { %p2590_p8 = pnand %p1979_p5, %p200_p7  ;;  %s212_s7 = sshll.u32 %s2502_s30, 4  ;;  %s2594_s7 = int_to_ptr.vmem [resolvable:$true] %s212_s7 }
   0xe   : > { %s2606_s9 = sadd.s32 1, %s2500_s24   ;;  %s82_s10 = sadd.s32 1, %s2496_s23 }
   0xf   : > { %s3035_s29 = scalar_select %p2590_p8, 1, 0 }
  0x10   : > { %p2271_p9 = pneg %p2590_p8  ;;  %s79_s11 = ssub.s32 %s2500_s24, %s2606_s9 }
  0x11   : > { %s2372_s14 = scalar_lea.hbm %s3027_s4, 1024 }
  0x12   : > { %p2601_p11 = pnand %p2271_p9, %p3030_p1  ;;  %p2373_p12 = scmp.ne.s32.totalorder %s3027_s4, %s2372_s14 }
  0x13   : > { %p2379_p5 = scmp.lt.u32.totalorder %s2372_s14, %s3027_s4 }
  0x14   : > { %p2374_p13 = pneg %p2601_p11 }
  0x16   : > { %p2375_p0 = pnand %p2374_p13, %p2373_p12 }
  0x18   : > { %p2376_p3 = pneg %p2375_p0 }
  0x1a   : > { %p2381_p7 = pnand %p2379_p5, %p2376_p3 }
  0x1c   : > { %2384 = shalt.err (!%p2381_p7)
}
  0x1d   : > { %s2385_s19 = scalar_lea.vmem %s2594_s7, 1024  ;;  %p2393_p2 = scmp.lt.s32.totalorder %s2594_s7, %s2594_s7 }
  0x1e   : > { %p2386_p9 = scmp.ne.s32.totalorder %s2594_s7, %s2385_s19  ;;  %p2394_p6 = scmp.lt.s32.totalorder %s2385_s19, %s2385_s19 }
  0x20   : > { %p2388_p10 = pnand %p2386_p9, %p2374_p13  ;;  %p2395_p4 = por %p2394_p6, %p2393_p2 }
  0x22   : > { %p2389_p1 = pneg %p2388_p10 }
  0x24   : > { %p2396_p8 = pnand %p2395_p4, %p2389_p1 }
  0x26   : > { %2399 = shalt.err (!%p2396_p8)
}
  0x27   : > { %s2503_s20 = smov 64   ;;  %s2504_s26 = smov 4  }
  0x28   : > { %2274 = dma.hbm_to_vmem [thread:$0]  (!%p2601_p11), %s3027_s4, 1024, %s2594_s7, [#allocation6], %s2503_s20, %s2503_s20, %s2504_s26  }
  0x29   : > { %p80_p1 = scmp.eq.s32.totalorder %s79_s11, 0  ;;  %p89_p2 = scmp.ne.s32.totalorder %s2496_s23, %s2492_s22 }
  0x2a   : > { %p90_p4 = scmp.eq.s32.totalorder %s2500_s24, 0  ;;  %p2284_p6 = scmp.lt.s32.totalorder %s2500_s24, 2 }
  0x2b   : > { %s2640_s13 = scalar_select %p80_p1, %s2496_s23, %s82_s10  }
  0x2c   : > { %p91_p8 = por %p90_p4, %p89_p2  ;;  %p3037_p10 = scmp.eq.s32.totalorder %s2571_s25, 1 }
  0x2d   : > { %s247_s8 = sand.u32 1, %s2496_s23   ;;  %s2036_s15 = sshll.u32 %s2500_s24, 7 }
  0x2e   : > { %p2644_p12 = por %p3037_p10, %p89_p2  ;;  %s1982_s16 = sshll.u32 %s247_s8, 3 }
  0x2f   : > { %s2653_s19 = scalar_lea.hbm %s3025_s2, %s2036_s15  ;;  %s251_s7 = scalar_lea.vmem [#allocation2], %s1982_s16 }
  0x30   : > { %s258_s10 = sshll.u32 %s251_s7, 4  ;;  %p2655_p11 = pnand %p2284_p6, %p91_p8  ;;  %s2659_s10 = int_to_ptr.vmem [resolvable:$true] %s258_s10 }
  0x31   : > { %s2661_s30 = scalar_lea.sflag [#allocation3], %s247_s8  ;;  %s2400_s12 = scalar_lea.hbm %s2653_s19, 128 }
  0x32   : > { %p2401_p13 = scmp.ne.s32.totalorder %s2653_s19, %s2400_s12  ;;  %p2402_p0 = pneg %p2655_p11 }
  0x33   : > { %s2405_s17 = scalar_lea.hbm %s3025_s2, 256  ;;  %p2406_p7 = scmp.lt.u32.totalorder %s2653_s19, %s3025_s2 }
  0x34   : > { %p2403_p3 = pnand %p2402_p0, %p2401_p13  ;;  %p2407_p9 = scmp.lt.u32.totalorder %s2405_s17, %s2400_s12 }
  0x35   : > { %p2409_p2 = scmp.lt.u32.totalorder %s2400_s12, %s2653_s19 }
  0x36   : > { %p2404_p5 = pneg %p2403_p3  ;;  %p2408_p1 = por %p2407_p9, %p2406_p7 }
  0x38   : > { %p2410_p4 = por %p2409_p2, %p2408_p1 }
  0x3a   : > { %p2411_p6 = pnand %p2410_p4, %p2404_p5 }
  0x3c   : > { %2414 = shalt.err (!%p2411_p6)
}
  0x3d   : > { %s2415_s8 = scalar_lea.vmem %s2659_s10, 128  ;;  %s2505_s15 = smov [#allocation2]  }
  0x3e   : > { %p2416_p8 = scmp.ne.s32.totalorder %s2659_s10, %s2415_s8  ;;  %s2420_s16 = sshll.u32 %s2505_s15, 4  ;;  %s2421_s16 = int_to_ptr.vmem [resolvable:$false] %s2420_s16 }
  0x3f   : > { %s2422_s18 = scalar_lea.vmem %s2421_s16, 256  ;;  %p2423_p3 = scmp.lt.s32.totalorder %s2659_s10, %s2421_s16 }
  0x40   : > { %p2418_p10 = pnand %p2416_p8, %p2402_p0  ;;  %p2424_p7 = scmp.lt.s32.totalorder %s2422_s18, %s2415_s8 }
  0x42   : > { %p2419_p13 = pneg %p2418_p10  ;;  %p2425_p9 = por %p2424_p7, %p2423_p3 }
  0x44   : > { %p2426_p1 = pnand %p2425_p9, %p2419_p13 }
  0x46   : > { %2429 = shalt.err (!%p2426_p1)
}
  0x47   : > { %2278 = dma.hbm_to_vmem [thread:$0]  (!%p2655_p11), %s2653_s19, 128, %s2659_s10, %s2661_s30, %s2503_s20, %s2503_s20, %s2504_s26  }
  0x48   : > { %p3040_p0 = scmp.ne.s32.totalorder %s3035_s29, 0 }
  0x49   : > { %s2695_s12 = sand.u32 (!%p3040_p0), 1, %s2492_s22   ;;  %p3041_p5 = scmp.ne.s32.totalorder (!%p3040_p0), %s3033_s27, 0 }
  0x4a   : > { %279 = sbr.rel (%p3040_p0) target bundleno = 4525 (0x11ad), region = 44  ;;  %s1986_s17 = sshll.u32 (!%p3040_p0), %s2695_s12, 3 }
  0x4b   : > { %s282_s7 = scalar_lea.sflag (!%p3040_p0), [#allocation3], %s2695_s12  ;;  %s2699_s8 = scalar_lea.vmem (!%p3040_p0), [#allocation2], %s1986_s17 }
  0x51   : > { %2475 = dma.done.wait (%p3041_p5), %s282_s7, 128  }
  0x52   : > { %2477 = vsyncadd (%p3041_p5), %s282_s7, 4294967168  ;;  %p3042_p11 = scmp.eq.s32.totalorder %s2571_s25, 0 }
  0x54   : > { %2479 = dma.done.wait (%p3042_p11), [#allocation6], 1024   ;;  %p3043_p2 = pmov %p3042_p11 }
  0x55   : > { %s1989_s29 = sshll.u32 %s2571_s25, 1  ;;  %v2506_v0 = vmov 0.0   ;;  %vm2507_vm0 = vmmov 0   ;;  %v2508_v1 = vmov 0   ;;  %v2331_v2 = vld [vmem:[#allocation5 + $0x10] sm:$0xff]   ;;  %v2332_v3 = vld [vmem:[#allocation5] sm:$0xff]   ;;  %v361_v10 = vlaneseq }
  0x56   : > { %2481 = vsyncadd (%p3043_p2), [#allocation6], 4294966272  ;;  %2103 = vmatprep.subr.bf16.mxu1 %v2506_v0  ;;  %2095 = vmatprep.subr.bf16.mxu0 %v2506_v0  ;;  %p334_p4 = scmp.lt.s32.totalorder %s1989_s29, 3  ;;  %v2333_v4 = vld [vmem:[#allocation5 + $0x18] sm:$0xff]   ;;  %v2334_v5 = vld [vmem:[#allocation5 + $0x8] sm:$0xff]   ;;  %vm382_vm1 = vcmask 261120  }
  0x57   : > { %2107 = vmatprep.mubr.msk.bf16.mxu1 %vm2507_vm0, %v2506_v0  ;;  %2099 = vmatprep.mubr.msk.bf16.mxu0 %vm2507_vm0, %v2506_v0  ;;  %v2735_v11 = vshrl.u32 %v361_v10, 7  ;;  %v2742_v15 = vld [vmem:[%s3028_s5] sm:$0xf]  ;;  %v2337_v25 = vld [vmem:[#allocation5 + $0x20] sm:$0xff]   ;;  %vm593_vm2 = vcmask 64512   ;;  %v2338_v33 = vld [vmem:[#allocation5 + $0x28] sm:$0xff]  }
  0x58   : > { %s3051_s29 = smov (!%p334_p4, %s1989_s29), 3  ;;  %2330 = vset.pattern.permute.xlu0 %v2508_v1  ;;  %2104 = vmatpush3.bf16.msra.mxu1 %v2331_v2  ;;  %v2339_v37 = vld [vmem:[%s2699_s8] sm:$0xff]   ;;  %s2510_s8 = smov 112   ;;  %vm655_vm3 = vcmask 1043456  }
  0x59   : > { %s1990_s27 = sshll.u32 %s3051_s29, 2  ;;  %s1994_s20 = sshll.u32 %s3051_s29, 3  ;;  %2096 = vmatpush3.bf16.msra.mxu0 %v2332_v3  ;;  %2105 = vmatprep.subr.bf16.mxu1 %v2506_v0  ;;  %v363_v13 = vsub.s32 0, %v2735_v11  ;;  %v436_v14 = vsub.s32 1, %v2735_v11  ;;  %v508_v42 = vsub.s32 2, %v2735_v11 }
  0x5a   : > { %s343_s10 = scalar_lea.vmem %s3024_s1, %s1990_s27  ;;  %s337_s15 = scalar_lea.vmem %s3023_s0, %s1990_s27  ;;  %2097 = vmatprep.subr.bf16.mxu0 %v2506_v0 }
  0x5b   : > { %s350_s17 = scalar_lea.vmem %s3026_s3, %s1994_s20  ;;  %v2335_v6 = vld [vmem:[%s343_s10] sm:$0xff]   ;;  %v364_v16 = vrot.slane %v2742_v15, %v363_v13  ;;  %v437_v17 = vrot.slane %v2742_v15, %v436_v14  ;;  %s2509_s27 = smov 120   ;;  %v509_v43 = vrot.slane %v2742_v15, %v508_v42 }
  0x5c   : > { %2106 = vmatpush3.bf16.msra.mxu1 %v2333_v4  ;;  %v2336_v7 = vld [vmem:[%s337_s15] sm:$0xff]   ;;  %v577_v9 = vld [vmem:[%s350_s17 + $0x8] sm:$0xff]  ;;  %s2511_s20 = smov 104   ;;  %s1988_s26 = sshll.u32 %s2695_s12, 4 }
  0x5d   : > { %v576_v8 = vld [vmem:[%s350_s17] sm:$0xff]  ;;  %2098 = vmatpush3.bf16.msra.mxu0 %v2334_v5  ;;  %2119 = vmatprep.subr.bf16.mxu1 %v2506_v0  ;;  %s2913_s19 = scalar_lea.vmem [#allocation7], %s1988_s26  ;;  %s2037_s10 = sshll.u32 %s2571_s25, 8 }
  0x5e   : > { %580 = vperm.xlu0 %2330, %v576_v8   ;;  %2111 = vmatprep.subr.bf16.mxu0 %v2506_v0  ;;  %s1859_s11 = sshll.u32 %s2913_s19, 4  ;;  %s2974_s16 = scalar_lea.hbm %s3029_s6, %s2037_s10  ;;  %s2976_s11 = int_to_ptr.vmem [resolvable:$true] %s1859_s11 }
  0x5f   : > { %2108 = vmatmul.mubr.msk.bf16.vlgmr.msra.gmra.mrb[0].mxu1 %vm382_vm1, %v2335_v6  ;;  %s1846_s25 = scalar_lea.sflag [#allocation4], %s2695_s12  ;;  %s2430_s18 = scalar_lea.vmem %s2976_s11, 256 }
  0x60   : > { %2100 = vmatmul.mubr.msk.bf16.vlgmr.msra.gmra.mrb[0].mxu0 %vm382_vm1, %v2336_v7  ;;  %2121 = vmatprep.mubr.msk.bf16.mxu1 %vm2507_vm0, %v2506_v0  ;;  %p2431_p6 = scmp.ne.s32.totalorder %s2976_s11, %s2430_s18  ;;  %s2512_s17 = smov [#allocation7]  }
  0x61   : > { %2115 = vmatprep.mubr.msk.bf16.mxu0 %vm2507_vm0, %v2506_v0  ;;  %2112 = vmatpush3.bf16.msra.mxu0 %v2337_v25  ;;  %s2434_s7 = sshll.u32 %s2512_s17, 4  ;;  %s2435_s7 = int_to_ptr.vmem [resolvable:$false] %s2434_s7 }
  0x62   : > { %585 = vperm.xlu0 %2330, %v577_v9   ;;  %2113 = vmatprep.subr.bf16.mxu0 %v2506_v0  ;;  %p2432_p8 = pnand %p2431_p6, %p2644_p12  ;;  %s2436_s29 = scalar_lea.vmem %s2435_s7, 512 }
  0x63   : > { %p2437_p13 = scmp.lt.s32.totalorder %s2976_s11, %s2435_s7  ;;  %p2438_p3 = scmp.lt.s32.totalorder %s2436_s29, %s2430_s18 }
  0x64   : > { %p2433_p10 = pneg %p2432_p8 }
  0x65   : > { %2114 = vmatpush3.bf16.msra.mxu0 %v2338_v33  ;;  %p2439_p7 = por %p2438_p3, %p2437_p13 }
  0x66   : > { %2125 = vmatprep.subr.bf16.mxu0 %v2506_v0 }
  0x67   : > { %p2440_p9 = pnand %p2439_p7, %p2433_p10 }
  0x68   : > { %2116 = vmatmul.mubr.msk.bf16.vlgmr.msra.gmra.mrb[4].mxu0 %vm382_vm1, %v2339_v37 }
  0x69   : > { %2127 = vmatprep.mubr.msk.bf16.mxu0 %vm2507_vm0, %v2506_v0 }
  0xdd   : > { %v581_v12 = vpop.permute.xlu0 %580 }
  0xe1   : > { %v586_v19 = vpop.permute.xlu0 %585 }
 0x132   : > { %v492_v18 = vpop.f32.mrb[0].mxu1 }
 0x133   : > { %v2109_v20 = vpop.f32.mrb[1].mxu1  ;;  %v420_v21 = vpop.f32.mrb[0].mxu0  ;;  %v493_v26 = vadd.f32 %v492_v18, %v437_v17 }
 0x134   : > { %v495_v22 = vpop.f32.mrb[2].mxu1  ;;  %v421_v23 = vadd.f32 %v420_v21, %v364_v16  ;;  %v2101_v24 = vpop.f32.mrb[1].mxu0  ;;  %v572_v21 = vld [vmem:[#allocation5 + $0x30] sm:$0xf] }
 0x135   : > { %v496_v27 = vadd.f32 %v495_v22, %v437_v17  ;;  %v2110_v28 = vpop.f32.mrb[3].mxu1  ;;  %v423_v29 = vpop.f32.mrb[2].mxu0  ;;  %v573_v17 = vld [vmem:[#allocation5 + $0x34] sm:$0xf]  ;;  %v2800_v24 = vsel %vm655_vm3, %v572_v21, 0 }
 0x136   : > { %v588_v30 = vmul.f32 %v581_v12, %v421_v23  ;;  %v424_v31 = vadd.f32 %v423_v29, %v364_v16  ;;  %v2102_v32 = vpop.f32.mrb[3].mxu0  ;;  %v2795_v18 = vsel %vm655_vm3, %v573_v17, 0 }
 0x137   : > { %v2746_v34 = vpack.c.bf16 %v496_v27, %v493_v26 }
 0x138   : > { %v589_v35 = vmul.f32 %v586_v19, %v424_v31 }
 0x139   : > { %704 = vrot.lane.b32.xlu1 %v2746_v34, %s2509_s27  ;;  %v598_v36 = vsel %vm593_vm2, %v2746_v34, 0 }
 0x13a   : > { %v2754_v38 = vpack.c.bf16 %v589_v35, %v588_v30  ;;  %2120 = vmatpush3.bf16.xpose.msra.mxu1 %v598_v36 }
 0x13b   : > { %2131 = vmatprep.subr.bf16.mxu1 %v2506_v0  ;;  %v564_v44 = vpop.f32.mrb[4].mxu0 }
 0x13c   : > { %v565_v45 = vadd.f32 %v564_v44, %v509_v43  ;;  %v2117_v46 = vpop.f32.mrb[5].mxu0  ;;  %v2850_v21 = vrot.slane %v2754_v38, 4 }
 0x13d   : > { %701 = vrot.lane.b32.xlu1 %v2754_v38, %s2509_s27  ;;  %v567_v47 = vpop.f32.mrb[6].mxu0 }
 0x13e   : > { %v568_v48 = vadd.f32 %v567_v47, %v509_v43  ;;  %v2118_v49 = vpop.f32.mrb[7].mxu0 }
 0x140   : > { %v2775_v53 = vpack.c.bf16 %v568_v48, %v565_v45 }
 0x141   : > { %2122 = vmatmul.mubr.msk.bf16.vlgmr.msra.gmra.mrb[4].mxu1 %vm593_vm2, %v2754_v38 }
 0x142   : > { %2133 = vmatprep.mubr.msk.bf16.mxu1 %vm2507_vm0, %v2506_v0  ;;  %v657_v3 = vsel %vm655_vm3, %v2775_v53, 0 }
 0x143   : > { %2126 = vmatpush3.bf16.msra.mxu0 %v657_v3 }
 0x144   : > { %2137 = vmatprep.subr.bf16.mxu0 %v2506_v0 }
 0x1ab   : > { %v705_v39 = vpop.permute.xlu1 %704 }
 0x1ac   : > { %v710_v40 = vsel %vm593_vm2, %v705_v39, 0 }
 0x1ad   : > { %2132 = vmatpush3.bf16.xpose.msra.mxu1 %v710_v40 }
 0x1ae   : > { %2143 = vmatprep.subr.bf16.mxu1 %v2506_v0 }
 0x1af   : > { %v702_v41 = vpop.permute.xlu1 %701 }
 0x1b4   : > { %2134 = vmatmul.mubr.msk.bf16.vlgmr.msra.gmra.mrb[8].mxu1 %vm593_vm2, %v702_v41 }
 0x1b5   : > { %2145 = vmatprep.mubr.msk.bf16.mxu1 %vm2507_vm0, %v2506_v0  ;;  %2144 = vmatpush3.bf16.msra.mxu1 %v2795_v18 }
 0x1b6   : > { %2155 = vmatprep.subr.bf16.mxu1 %v2506_v0 }
 0x214   : > { %v634_v50 = vpop.f32.mrb[4].mxu1 }
 0x215   : > { %v2123_v51 = vpop.f32.mrb[5].mxu1  ;;  %v640_v52 = vsel %vm593_vm2, %v634_v50, -inf }
 0x216   : > { %641 = vmax.xlane.f32.xlu0 %v640_v52  ;;  %v637_v54 = vpop.f32.mrb[6].mxu1 }
 0x217   : > { %v2124_v55 = vpop.f32.mrb[7].mxu1 }
 0x287   : > { %v746_v56 = vpop.f32.mrb[8].mxu1 }
 0x288   : > { %v2135_v57 = vpop.f32.mrb[9].mxu1  ;;  %v752_v58 = vsel %vm593_vm2, %v746_v56, -inf }
 0x289   : > { %753 = vmax.xlane.f32.xlu1 %v752_v58  ;;  %v749_v59 = vpop.f32.mrb[10].mxu1 }
 0x28a   : > { %v2136_v60 = vpop.f32.mrb[11].mxu1 }
 0x29a   : > { %765 = vrot.lane.b32.xlu1 %v2775_v53, %s2509_s27 }
 0x29e   : > { %906 = vrot.lane.b32.xlu1 %v2754_v38, %s2510_s8 }
 0x2a3   : > { %v642_v61 = vpop.xlane.xlu0 %641 }
 0x2a4   : > { %v643_v62 = vsub.f32 %v634_v50, %v642_v61 }
 0x2a6   : > { %v644_v63 = vmul.f32 1.442695, %v643_v62 }
 0x2a8   : > { %2340 = vpow2.f32 %v644_v63 }
 0x2b2   : > { %v2341_v1 = vpop.eup %2340 }
 0x2b3   : > { %v646_v2 = vsel %vm593_vm2, %v2341_v1, 0.0 }
 0x2b4   : > { %647 = vadd.xlane.f32.xlu0 %v646_v2 }
 0x316   : > { %v754_v4 = vpop.xlane.xlu1 %753 }
 0x317   : > { %v755_v5 = vsub.f32 %v746_v56, %v754_v4 }
 0x319   : > { %v756_v6 = vmul.f32 1.442695, %v755_v5 }
 0x31a   : > { %v766_v13 = vpop.permute.xlu1 %765 }
 0x31b   : > { %2342 = vpow2.f32 %v756_v6  ;;  %v771_v14 = vsel %vm655_vm3, %v766_v13, 0  ;;  %v574_v6 = vld [vmem:[#allocation5 + $0x38] sm:$0xf] }
 0x31e   : > { %v907_v39 = vpop.permute.xlu1 %906 }
 0x325   : > { %v2343_v7 = vpop.eup %2342 }
 0x326   : > { %v758_v8 = vsel %vm593_vm2, %v2343_v7, 0.0 }
 0x327   : > { %759 = vadd.xlane.f32.xlu0 %v758_v8 }
 0x33d   : > { %908 = vrot.lane.b32.xlu0 %v2746_v34, %s2510_s8 }
 0x341   : > { %v648_v9 = vpop.xlane.xlu0 %647 }
 0x342   : > { %2344 = vrcp.f32 %v648_v9 }
 0x34c   : > { %v2345_v10 = vpop.eup %2344 }
 0x34d   : > { %v650_v12 = vmul.f32 %v2345_v10, %v2341_v1 }
 0x34f   : > { %v651_v16 = vpack.c.bf16 %v650_v12, %v650_v12 }
 0x351   : > { %2128 = vmatmul.mubr.msk.bf16.vlgmr.msra.gmra.mrb[8].mxu0 %vm593_vm2, %v651_v16 }
 0x352   : > { %2138 = vmatpush3.bf16.msra.mxu0 %v771_v14  ;;  %2139 = vmatprep.mubr.msk.bf16.mxu0 %vm2507_vm0, %v2506_v0 }
 0x353   : > { %2149 = vmatprep.subr.bf16.mxu0 %v2506_v0 }
 0x3b4   : > { %v760_v19 = vpop.xlane.xlu0 %759 }
 0x3b5   : > { %2346 = vrcp.f32 %v760_v19 }
 0x3b8   : > { %v909_v30 = vpop.permute.xlu0 %908 }
 0x3b9   : > { %v914_v36 = vsel %vm593_vm2, %v909_v30, 0  ;;  %v575_v30 = vld [vmem:[#allocation5 + $0x3c] sm:$0xf] }
 0x3bf   : > { %v2347_v20 = vpop.eup %2346 }
 0x3c0   : > { %v762_v22 = vmul.f32 %v2347_v20, %v2343_v7  ;;  %v2839_v7 = vsel %vm655_vm3, %v574_v6, 0 }
 0x3c2   : > { %v763_v23 = vpack.c.bf16 %v762_v22, %v762_v22 }
 0x3c4   : > { %2140 = vmatmul.mubr.msk.bf16.vlgmr.msra.gmra.mrb[12].mxu0 %vm593_vm2, %v763_v23 }
 0x3c5   : > { %2150 = vmatpush3.bf16.msra.mxu0 %v2800_v24  ;;  %2151 = vmatprep.mubr.msk.bf16.mxu0 %vm2507_vm0, %v2506_v0 }
 0x3c6   : > { %2161 = vmatprep.subr.bf16.mxu0 %v2506_v0 }
 0x424   : > { %v693_v25 = vpop.f32.mrb[8].mxu0 }
 0x425   : > { %v699_v26 = vpack.c.bf16 %v693_v25, %v693_v25  ;;  %v2129_v27 = vpop.f32.mrb[9].mxu0 }
 0x426   : > { %v696_v28 = vpop.f32.mrb[10].mxu0 }
 0x427   : > { %v2130_v29 = vpop.f32.mrb[11].mxu0  ;;  %2152 = vmatmul.mubr.msk.bf16.vlgmr.msra.gmra.mrb[16].mxu0 %vm593_vm2, %v699_v26 }
 0x428   : > { %2163 = vmatprep.mubr.msk.bf16.mxu0 %vm2507_vm0, %v2506_v0 }
 0x497   : > { %v807_v31 = vpop.f32.mrb[12].mxu0 }
 0x498   : > { %v813_v32 = vpack.c.bf16 %v807_v31, %v807_v31  ;;  %v2141_v33 = vpop.f32.mrb[13].mxu0 }
 0x499   : > { %v810_v35 = vpop.f32.mrb[14].mxu0 }
 0x49a   : > { %v2142_v37 = vpop.f32.mrb[15].mxu0  ;;  %2146 = vmatmul.mubr.msk.bf16.vlgmr.msra.gmra.mrb[12].mxu1 %vm593_vm2, %v813_v32  ;;  %v2863_v32 = vsel %vm655_vm3, %v575_v30, 0 }
 0x49b   : > { %2156 = vmatpush3.bf16.xpose.msra.mxu1 %v914_v36  ;;  %2157 = vmatprep.mubr.msk.bf16.mxu1 %vm2507_vm0, %v2506_v0 }
 0x49c   : > { %2167 = vmatprep.subr.bf16.mxu1 %v2506_v0 }
 0x4a2   : > { %2158 = vmatmul.mubr.msk.bf16.vlgmr.msra.gmra.mrb[16].mxu1 %vm593_vm2, %v907_v39 }
 0x4a3   : > { %2169 = vmatprep.mubr.msk.bf16.mxu1 %vm2507_vm0, %v2506_v0  ;;  %2168 = vmatpush3.bf16.msra.mxu1 %v2839_v7 }
 0x4a4   : > { %2179 = vmatprep.subr.bf16.mxu1 %v2506_v0 }
 0x4fa   : > { %v900_v40 = vpop.f32.mrb[16].mxu0 }
 0x4fb   : > { %v2153_v41 = vpop.f32.mrb[17].mxu0 }
 0x4fc   : > { %v903_v42 = vpop.f32.mrb[18].mxu0 }
 0x4fd   : > { %v2154_v43 = vpop.f32.mrb[19].mxu0 }
 0x56d   : > { %v854_v44 = vpop.f32.mrb[12].mxu1 }
 0x56e   : > { %v2818_v45 = vadd.f32 %v900_v40, %v854_v44  ;;  %v2147_v46 = vpop.f32.mrb[13].mxu1 }
 0x56f   : > { %v857_v47 = vpop.f32.mrb[14].mxu1  ;;  %v2888_v46 = vrot.slane %v2775_v53, 4 }
 0x570   : > { %v2148_v48 = vpop.f32.mrb[15].mxu1 }
 0x575   : > { %v950_v49 = vpop.f32.mrb[16].mxu1 }
 0x576   : > { %v2159_v50 = vpop.f32.mrb[17].mxu1  ;;  %v956_v51 = vsel %vm593_vm2, %v950_v49, -inf }
 0x577   : > { %957 = vmax.xlane.f32.xlu1 %v956_v51  ;;  %v953_v52 = vpop.f32.mrb[18].mxu1 }
 0x578   : > { %v2160_v54 = vpop.f32.mrb[19].mxu1  ;;  %v1293_v52 = vsel %vm655_vm3, %v2888_v46, 0 }
 0x588   : > { %1066 = vrot.lane.b32.xlu1 %v2746_v34, %s2511_s20 }
 0x58c   : > { %1064 = vrot.lane.b32.xlu1 %v2754_v38, %s2511_s20  ;;  %v2858_v38 = vrot.slane %v2746_v34, 4 }
 0x58e   : > { %v1234_v42 = vsel %vm593_vm2, %v2858_v38, 0 }
 0x604   : > { %v958_v55 = vpop.xlane.xlu1 %957 }
 0x605   : > { %v959_v56 = vsub.f32 %v950_v49, %v958_v55 }
 0x607   : > { %v960_v57 = vmul.f32 1.442695, %v959_v56 }
 0x608   : > { %v1067_v2 = vpop.permute.xlu1 %1066 }
 0x609   : > { %2348 = vpow2.f32 %v960_v57  ;;  %v1072_v4 = vsel %vm593_vm2, %v1067_v2, 0 }
 0x60c   : > { %v1065_v5 = vpop.permute.xlu1 %1064 }
 0x613   : > { %v2349_v58 = vpop.eup %2348 }
 0x614   : > { %v962_v59 = vsel %vm593_vm2, %v2349_v58, 0.0 }
 0x615   : > { %963 = vadd.xlane.f32.xlu0 %v962_v59 }
 0x62b   : > { %968 = vrot.lane.b32.xlu0 %v2775_v53, %s2510_s8 }
 0x6a2   : > { %v964_v60 = vpop.xlane.xlu0 %963 }
 0x6a3   : > { %2350 = vrcp.f32 %v964_v60 }
 0x6a6   : > { %v969_v61 = vpop.permute.xlu0 %968 }
 0x6a7   : > { %v974_v62 = vsel %vm655_vm3, %v969_v61, 0 }
 0x6a8   : > { %2162 = vmatpush3.bf16.msra.mxu0 %v974_v62 }
 0x6a9   : > { %2173 = vmatprep.subr.bf16.mxu0 %v2506_v0 }
 0x6ad   : > { %v2351_v63 = vpop.eup %2350 }
 0x6ae   : > { %v966_v1 = vmul.f32 %v2351_v63, %v2349_v58 }
 0x6b0   : > { %v967_v3 = vpack.c.bf16 %v966_v1, %v966_v1 }
 0x6b2   : > { %2164 = vmatmul.mubr.msk.bf16.vlgmr.msra.gmra.mrb[20].mxu0 %vm593_vm2, %v967_v3 }
 0x6b3   : > { %2174 = vmatpush3.bf16.xpose.msra.mxu0 %v1072_v4  ;;  %2175 = vmatprep.mubr.msk.bf16.mxu0 %vm2507_vm0, %v2506_v0 }
 0x6b4   : > { %2185 = vmatprep.subr.bf16.mxu0 %v2506_v0 }
 0x6ba   : > { %2176 = vmatmul.mubr.msk.bf16.vlgmr.msra.gmra.mrb[24].mxu0 %vm593_vm2, %v1065_v5 }
 0x6bb   : > { %2187 = vmatprep.mubr.msk.bf16.mxu0 %vm2507_vm0, %v2506_v0  ;;  %2186 = vmatpush3.bf16.msra.mxu0 %v2863_v32 }
 0x6bc   : > { %2197 = vmatprep.subr.bf16.mxu0 %v2506_v0 }
 0x785   : > { %v1010_v8 = vpop.f32.mrb[20].mxu0 }
 0x786   : > { %v1016_v9 = vpack.c.bf16 %v1010_v8, %v1010_v8  ;;  %v2165_v10 = vpop.f32.mrb[21].mxu0 }
 0x787   : > { %v1013_v12 = vpop.f32.mrb[22].mxu0  ;;  %v1224_v10 = vsub.s32 3, %v2735_v11 }
 0x788   : > { %v2166_v13 = vpop.f32.mrb[23].mxu0  ;;  %2170 = vmatmul.mubr.msk.bf16.vlgmr.msra.gmra.mrb[20].mxu1 %vm593_vm2, %v1016_v9 }
 0x789   : > { %2181 = vmatprep.mubr.msk.bf16.mxu1 %vm2507_vm0, %v2506_v0  ;;  %v2909_v12 = vrot.slane %v2742_v15, %v1224_v10 }
 0x78d   : > { %v1108_v14 = vpop.f32.mrb[24].mxu0 }
 0x78e   : > { %v2177_v16 = vpop.f32.mrb[25].mxu0  ;;  %v1114_v17 = vsel %vm593_vm2, %v1108_v14, -inf }
 0x78f   : > { %1115 = vmax.xlane.f32.xlu0 %v1114_v17  ;;  %v1111_v19 = vpop.f32.mrb[26].mxu0 }
 0x790   : > { %v2178_v20 = vpop.f32.mrb[27].mxu0 }
 0x7a5   : > { %1126 = vrot.lane.b32.xlu0 %v2775_v53, %s2511_s20 }
 0x7a9   : > { %1336 = vrot.lane.b32.xlu0 %v2850_v21, %s2509_s27 }
 0x81c   : > { %v1116_v22 = vpop.xlane.xlu0 %1115 }
 0x81d   : > { %v1117_v23 = vsub.f32 %v1108_v14, %v1116_v22 }
 0x81f   : > { %v1118_v25 = vmul.f32 1.442695, %v1117_v23 }
 0x820   : > { %v1127_v26 = vpop.permute.xlu0 %1126 }
 0x821   : > { %2352 = vpow2.f32 %v1118_v25  ;;  %v1132_v27 = vsel %vm655_vm3, %v1127_v26, 0 }
 0x822   : > { %2180 = vmatpush3.bf16.msra.mxu1 %v1132_v27 }
 0x823   : > { %2191 = vmatprep.subr.bf16.mxu1 %v2506_v0 }
 0x82b   : > { %v2353_v28 = vpop.eup %2352 }
 0x82c   : > { %v1120_v29 = vsel %vm593_vm2, %v2353_v28, 0.0 }
 0x82d   : > { %1121 = vadd.xlane.f32.xlu1 %v1120_v29 }
 0x83e   : > { %1338 = vrot.lane.b32.xlu1 %v2858_v38, %s2509_s27 }
 0x85b   : > { %v1057_v31 = vpop.f32.mrb[20].mxu1 }
 0x85c   : > { %v2866_v33 = vadd.f32 %v1057_v31, %v2818_v45  ;;  %v2171_v35 = vpop.f32.mrb[21].mxu1  ;;  %v1337_v45 = vpop.permute.xlu0 %1336 }
 0x85d   : > { %v1060_v36 = vpop.f32.mrb[22].mxu1 }
 0x85e   : > { %v2172_v37 = vpop.f32.mrb[23].mxu1 }
 0x8ba   : > { %v1122_v34 = vpop.xlane.xlu1 %1121 }
 0x8bb   : > { %2354 = vrcp.f32 %v1122_v34 }
 0x8be   : > { %v1339_v43 = vpop.permute.xlu1 %1338 }
 0x8bf   : > { %v1344_v44 = vsel %vm593_vm2, %v1339_v43, 0 }
 0x8c5   : > { %v2355_v39 = vpop.eup %2354 }
 0x8c6   : > { %v1124_v40 = vmul.f32 %v2355_v39, %v2353_v28 }
 0x8c8   : > { %v1125_v41 = vpack.c.bf16 %v1124_v40, %v1124_v40 }
 0x8ca   : > { %2182 = vmatmul.mubr.msk.bf16.vlgmr.msra.gmra.mrb[24].mxu1 %vm593_vm2, %v1125_v41 }
 0x8cb   : > { %2192 = vmatpush3.bf16.xpose.msra.mxu1 %v1234_v42  ;;  %2193 = vmatprep.mubr.msk.bf16.mxu1 %vm2507_vm0, %v2506_v0 }
 0x8cc   : > { %2203 = vmatprep.subr.bf16.mxu1 %v2506_v0 }
 0x8d2   : > { %2194 = vmatmul.mubr.msk.bf16.vlgmr.msra.gmra.mrb[28].mxu1 %vm593_vm2, %v2850_v21 }
 0x8d3   : > { %2204 = vmatpush3.bf16.xpose.msra.mxu1 %v1344_v44  ;;  %2205 = vmatprep.mubr.msk.bf16.mxu1 %vm2507_vm0, %v2506_v0 }
 0x8d4   : > { %2215 = vmatprep.subr.bf16.mxu1 %v2506_v0 }
 0x8da   : > { %2206 = vmatmul.mubr.msk.bf16.vlgmr.msra.gmra.mrb[32].mxu1 %vm593_vm2, %v1337_v45 }
 0x8db   : > { %2216 = vmatpush3.bf16.msra.mxu1 %v2795_v18  ;;  %2217 = vmatprep.mubr.msk.bf16.mxu1 %vm2507_vm0, %v2506_v0 }
 0x8dc   : > { %2227 = vmatprep.subr.bf16.mxu1 %v2506_v0 }
 0x99d   : > { %v1168_v47 = vpop.f32.mrb[24].mxu1 }
 0x99e   : > { %v1174_v48 = vpack.c.bf16 %v1168_v47, %v1168_v47  ;;  %v2183_v49 = vpop.f32.mrb[25].mxu1 }
 0x99f   : > { %v1171_v50 = vpop.f32.mrb[26].mxu1 }
 0x9a0   : > { %v2184_v51 = vpop.f32.mrb[27].mxu1  ;;  %2188 = vmatmul.mubr.msk.bf16.vlgmr.msra.gmra.mrb[28].mxu0 %vm593_vm2, %v1174_v48 }
 0x9a1   : > { %2198 = vmatpush3.bf16.msra.mxu0 %v1293_v52  ;;  %2199 = vmatprep.mubr.msk.bf16.mxu0 %vm2507_vm0, %v2506_v0 }
 0x9a2   : > { %2209 = vmatprep.subr.bf16.mxu0 %v2506_v0 }
 0x9a5   : > { %v1270_v18 = vpop.f32.mrb[28].mxu1 }
 0x9a6   : > { %v2195_v54 = vpop.f32.mrb[29].mxu1  ;;  %v1276_v53 = vsel %vm593_vm2, %v1270_v18, -inf }
 0x9a7   : > { %1277 = vmax.xlane.f32.xlu1 %v1276_v53  ;;  %v1273_v55 = vpop.f32.mrb[30].mxu1 }
 0x9a8   : > { %v2196_v56 = vpop.f32.mrb[31].mxu1 }
 0x9ad   : > { %v1380_v57 = vpop.f32.mrb[32].mxu1 }
 0x9ae   : > { %v2207_v58 = vpop.f32.mrb[33].mxu1  ;;  %v1386_v59 = vsel %vm593_vm2, %v1380_v57, -inf }
 0x9af   : > { %1387 = vmax.xlane.f32.xlu0 %v1386_v59  ;;  %v1383_v60 = vpop.f32.mrb[34].mxu1 }
 0x9b0   : > { %v2208_v61 = vpop.f32.mrb[35].mxu1 }
 0xa34   : > { %v1278_v62 = vpop.xlane.xlu1 %1277 }
 0xa35   : > { %v1279_v63 = vsub.f32 %v1270_v18, %v1278_v62 }
 0xa37   : > { %v1280_v1 = vmul.f32 1.442695, %v1279_v63 }
 0xa39   : > { %2356 = vpow2.f32 %v1280_v1 }
 0xa3c   : > { %v1388_v2 = vpop.xlane.xlu0 %1387 }
 0xa3d   : > { %v1389_v3 = vsub.f32 %v1380_v57, %v1388_v2 }
 0xa3f   : > { %v1390_v4 = vmul.f32 1.442695, %v1389_v3 }
 0xa41   : > { %2358 = vpow2.f32 %v1390_v4 }
 0xa43   : > { %v2357_v5 = vpop.eup %2356 }
 0xa44   : > { %v1282_v6 = vsel %vm593_vm2, %v2357_v5, 0.0 }
 0xa45   : > { %1283 = vadd.xlane.f32.xlu0 %v1282_v6 }
 0xa4b   : > { %v2359_v8 = vpop.eup %2358 }
 0xa4c   : > { %v1392_v9 = vsel %vm593_vm2, %v2359_v8, 0.0 }
 0xa4d   : > { %1393 = vadd.xlane.f32.xlu1 %v1392_v9 }
 0xa5b   : > { %1398 = vrot.lane.b32.xlu0 %v2888_v46, %s2509_s27 }
 0xa5e   : > { %1535 = vrot.lane.b32.xlu1 %v2858_v38, %s2510_s8 }
 0xa62   : > { %1533 = vrot.lane.b32.xlu1 %v2850_v21, %s2510_s8 }
 0xa73   : > { %v1215_v13 = vpop.f32.mrb[28].mxu0 }
 0xa74   : > { %v1221_v14 = vadd.f32 %v1215_v13, %v2866_v33  ;;  %v2189_v16 = vpop.f32.mrb[29].mxu0 }
 0xa75   : > { %v1218_v17 = vpop.f32.mrb[30].mxu0 }
 0xa76   : > { %v1226_v19 = vadd.f32 %v2909_v12, %v1221_v14  ;;  %v2190_v20 = vpop.f32.mrb[31].mxu0 }
 0xa78   : > { %1227 = vst.msk [vmem:[%s2913_s19] sm:$0xff] %vm382_vm1, %v1226_v19 }
 0xad2   : > { %v1284_v22 = vpop.xlane.xlu0 %1283 }
 0xad3   : > { %2360 = vrcp.f32 %v1284_v22 }
 0xad6   : > { %v1399_v25 = vpop.permute.xlu0 %1398 }
 0xad7   : > { %v1404_v27 = vsel %vm655_vm3, %v1399_v25, 0 }
 0xada   : > { %v1394_v11 = vpop.xlane.xlu1 %1393 }
 0xadb   : > { %2362 = vrcp.f32 %v1394_v11 }
 0xadd   : > { %v2361_v23 = vpop.eup %2360 }
 0xade   : > { %v1286_v15 = vmul.f32 %v2361_v23, %v2357_v5  ;;  %v1536_v34 = vpop.permute.xlu1 %1535 }
 0xadf   : > { %v1541_v42 = vsel %vm593_vm2, %v1536_v34, 0 }
 0xae0   : > { %v1287_v26 = vpack.c.bf16 %v1286_v15, %v1286_v15 }
 0xae2   : > { %2200 = vmatmul.mubr.msk.bf16.vlgmr.msra.gmra.mrb[32].mxu0 %vm593_vm2, %v1287_v26  ;;  %v1534_v44 = vpop.permute.xlu1 %1533 }
 0xae3   : > { %2210 = vmatpush3.bf16.msra.mxu0 %v1404_v27  ;;  %2211 = vmatprep.mubr.msk.bf16.mxu0 %vm2507_vm0, %v2506_v0 }
 0xae4   : > { %2221 = vmatprep.subr.bf16.mxu0 %v2506_v0 }
 0xae5   : > { %v2363_v28 = vpop.eup %2362 }
 0xae6   : > { %v1396_v29 = vmul.f32 %v2363_v28, %v2359_v8 }
 0xae8   : > { %v1397_v30 = vpack.c.bf16 %v1396_v29, %v1396_v29 }
 0xaea   : > { %2212 = vmatmul.mubr.msk.bf16.vlgmr.msra.gmra.mrb[36].mxu0 %vm593_vm2, %v1397_v30 }
 0xaeb   : > { %2222 = vmatpush3.bf16.msra.mxu0 %v2800_v24  ;;  %2223 = vmatprep.mubr.msk.bf16.mxu0 %vm2507_vm0, %v2506_v0 }
 0xaec   : > { %2233 = vmatprep.subr.bf16.mxu0 %v2506_v0 }
 0xbb5   : > { %v1329_v31 = vpop.f32.mrb[32].mxu0 }
 0xbb6   : > { %v1335_v33 = vpack.c.bf16 %v1329_v31, %v1329_v31  ;;  %v2201_v35 = vpop.f32.mrb[33].mxu0 }
 0xbb7   : > { %v1332_v36 = vpop.f32.mrb[34].mxu0 }
 0xbb8   : > { %v2202_v37 = vpop.f32.mrb[35].mxu0  ;;  %2224 = vmatmul.mubr.msk.bf16.vlgmr.msra.gmra.mrb[40].mxu0 %vm593_vm2, %v1335_v33 }
 0xbb9   : > { %2235 = vmatprep.mubr.msk.bf16.mxu0 %vm2507_vm0, %v2506_v0 }
 0xbbd   : > { %v1440_v39 = vpop.f32.mrb[36].mxu0 }
 0xbbe   : > { %v1446_v40 = vpack.c.bf16 %v1440_v39, %v1440_v39  ;;  %v2213_v41 = vpop.f32.mrb[37].mxu0 }
 0xbbf   : > { %v1443_v24 = vpop.f32.mrb[38].mxu0 }
 0xbc0   : > { %v2214_v43 = vpop.f32.mrb[39].mxu0  ;;  %2218 = vmatmul.mubr.msk.bf16.vlgmr.msra.gmra.mrb[36].mxu1 %vm593_vm2, %v1446_v40 }
 0xbc1   : > { %2228 = vmatpush3.bf16.xpose.msra.mxu1 %v1541_v42  ;;  %2229 = vmatprep.mubr.msk.bf16.mxu1 %vm2507_vm0, %v2506_v0 }
 0xbc2   : > { %2239 = vmatprep.subr.bf16.mxu1 %v2506_v0 }
 0xbc8   : > { %2230 = vmatmul.mubr.msk.bf16.vlgmr.msra.gmra.mrb[40].mxu1 %vm593_vm2, %v1534_v44 }
 0xbc9   : > { %2240 = vmatpush3.bf16.msra.mxu1 %v2839_v7  ;;  %2241 = vmatprep.mubr.msk.bf16.mxu1 %vm2507_vm0, %v2506_v0 }
 0xbca   : > { %2251 = vmatprep.subr.bf16.mxu1 %v2506_v0 }
 0xc8b   : > { %v1527_v45 = vpop.f32.mrb[40].mxu0 }
 0xc8c   : > { %v2225_v47 = vpop.f32.mrb[41].mxu0 }
 0xc8d   : > { %v1530_v48 = vpop.f32.mrb[42].mxu0 }
 0xc8e   : > { %v2226_v49 = vpop.f32.mrb[43].mxu0 }
 0xc93   : > { %v1484_v50 = vpop.f32.mrb[36].mxu1 }
 0xc94   : > { %v1528_v51 = vadd.f32 %v1527_v45, %v1484_v50  ;;  %v2219_v52 = vpop.f32.mrb[37].mxu1 }
 0xc95   : > { %v1487_v18 = vpop.f32.mrb[38].mxu1 }
 0xc96   : > { %v2220_v54 = vpop.f32.mrb[39].mxu1 }
 0xc9b   : > { %v1577_v53 = vpop.f32.mrb[40].mxu1 }
 0xc9c   : > { %v2231_v55 = vpop.f32.mrb[41].mxu1  ;;  %v1583_v56 = vsel %vm593_vm2, %v1577_v53, -inf }
 0xc9d   : > { %1584 = vmax.xlane.f32.xlu0 %v1583_v56  ;;  %v1580_v7 = vpop.f32.mrb[42].mxu1 }
 0xc9e   : > { %v2232_v57 = vpop.f32.mrb[43].mxu1 }
 0xcb3   : > { %1595 = vrot.lane.b32.xlu0 %v2888_v46, %s2510_s8 }
 0xcb7   : > { %1688 = vrot.lane.b32.xlu0 %v2850_v21, %s2511_s20 }
 0xd2a   : > { %v1585_v58 = vpop.xlane.xlu0 %1584 }
 0xd2b   : > { %v1586_v59 = vsub.f32 %v1577_v53, %v1585_v58 }
 0xd2d   : > { %v1587_v60 = vmul.f32 1.442695, %v1586_v59 }
 0xd2e   : > { %v1596_v61 = vpop.permute.xlu0 %1595 }
 0xd2f   : > { %2364 = vpow2.f32 %v1587_v60  ;;  %v1601_v62 = vsel %vm655_vm3, %v1596_v61, 0 }
 0xd30   : > { %2234 = vmatpush3.bf16.msra.mxu0 %v1601_v62 }
 0xd31   : > { %2245 = vmatprep.subr.bf16.mxu0 %v2506_v0 }
 0xd32   : > { %v1689_v8 = vpop.permute.xlu0 %1688 }
 0xd39   : > { %v2365_v63 = vpop.eup %2364 }
 0xd3a   : > { %v1589_v1 = vsel %vm593_vm2, %v2365_v63, 0.0 }
 0xd3b   : > { %1590 = vadd.xlane.f32.xlu1 %v1589_v1 }
 0xd4c   : > { %1690 = vrot.lane.b32.xlu1 %v2858_v38, %s2511_s20 }
 0xdc8   : > { %v1591_v2 = vpop.xlane.xlu1 %1590 }
 0xdc9   : > { %2366 = vrcp.f32 %v1591_v2 }
 0xdcc   : > { %v1691_v4 = vpop.permute.xlu1 %1690 }
 0xdcd   : > { %v1696_v6 = vsel %vm593_vm2, %v1691_v4, 0 }
 0xdd3   : > { %v2367_v21 = vpop.eup %2366 }
 0xdd4   : > { %v1593_v3 = vmul.f32 %v2367_v21, %v2365_v63 }
 0xdd6   : > { %v1594_v5 = vpack.c.bf16 %v1593_v3, %v1593_v3 }
 0xdd8   : > { %2236 = vmatmul.mubr.msk.bf16.vlgmr.msra.gmra.mrb[44].mxu0 %vm593_vm2, %v1594_v5 }
 0xdd9   : > { %2246 = vmatpush3.bf16.xpose.msra.mxu0 %v1696_v6  ;;  %2247 = vmatprep.mubr.msk.bf16.mxu0 %vm2507_vm0, %v2506_v0 }
 0xdda   : > { %2257 = vmatprep.subr.bf16.mxu0 %v2506_v0 }
 0xde0   : > { %2248 = vmatmul.mubr.msk.bf16.vlgmr.msra.gmra.mrb[48].mxu0 %vm593_vm2, %v1689_v8 }
 0xde1   : > { %2258 = vmatpush3.bf16.msra.mxu0 %v2863_v32  ;;  %2259 = vmatprep.mubr.msk.bf16.mxu0 %vm2507_vm0, %v2506_v0 }
 0xeab   : > { %v1637_v38 = vpop.f32.mrb[44].mxu0 }
 0xeac   : > { %v1643_v9 = vpack.c.bf16 %v1637_v38, %v1637_v38  ;;  %v2237_v10 = vpop.f32.mrb[45].mxu0 }
 0xead   : > { %v1640_v13 = vpop.f32.mrb[46].mxu0 }
 0xeae   : > { %v2238_v14 = vpop.f32.mrb[47].mxu0  ;;  %2242 = vmatmul.mubr.msk.bf16.vlgmr.msra.gmra.mrb[44].mxu1 %vm593_vm2, %v1643_v9 }
 0xeaf   : > { %2253 = vmatprep.mubr.msk.bf16.mxu1 %vm2507_vm0, %v2506_v0 }
 0xeb3   : > { %v1732_v16 = vpop.f32.mrb[48].mxu0 }
 0xeb4   : > { %v2249_v17 = vpop.f32.mrb[49].mxu0  ;;  %v1738_v19 = vsel %vm593_vm2, %v1732_v16, -inf }
 0xeb5   : > { %1739 = vmax.xlane.f32.xlu1 %v1738_v19  ;;  %v1735_v20 = vpop.f32.mrb[50].mxu0 }
 0xeb6   : > { %v2250_v32 = vpop.f32.mrb[51].mxu0 }
 0xf42   : > { %v1740_v22 = vpop.xlane.xlu1 %1739 }
 0xf43   : > { %v1741_v11 = vsub.f32 %v1732_v16, %v1740_v22 }
 0xf45   : > { %v1742_v23 = vmul.f32 1.442695, %v1741_v11 }
 0xf47   : > { %2368 = vpow2.f32 %v1742_v23 }
 0xf51   : > { %v2369_v15 = vpop.eup %2368 }
 0xf52   : > { %v1744_v25 = vsel %vm593_vm2, %v2369_v15, 0.0 }
 0xf53   : > { %1745 = vadd.xlane.f32.xlu0 %v1744_v25 }
 0xf69   : > { %1750 = vrot.lane.b32.xlu0 %v2888_v46, %s2511_s20 }
 0xf81   : > { %v1681_v26 = vpop.f32.mrb[44].mxu1 }
 0xf82   : > { %v1687_v0 = vadd.f32 %v1681_v26, %v1528_v51  ;;  %v2243_v27 = vpop.f32.mrb[45].mxu1 }
 0xf83   : > { %v1684_v28 = vpop.f32.mrb[46].mxu1 }
 0xf84   : > { %v2244_v29 = vpop.f32.mrb[47].mxu1 }
 0xfe0   : > { %v1746_v30 = vpop.xlane.xlu0 %1745 }
 0xfe1   : > { %2370 = vrcp.f32 %v1746_v30 }
 0xfe4   : > { %v1751_v31 = vpop.permute.xlu0 %1750 }
 0xfe5   : > { %v1756_v33 = vsel %vm655_vm3, %v1751_v31, 0 }
 0xfe6   : > { %2252 = vmatpush3.bf16.msra.mxu1 %v1756_v33 }
 0xfeb   : > { %v2371_v35 = vpop.eup %2370 }
 0xfec   : > { %v1748_v36 = vmul.f32 %v2371_v35, %v2369_v15 }
 0xfee   : > { %v1749_v37 = vpack.c.bf16 %v1748_v36, %v1748_v36 }
 0xff0   : > { %2254 = vmatmul.mubr.msk.bf16.vlgmr.msra.gmra.mrb[48].mxu1 %vm593_vm2, %v1749_v37 }
0x10c3   : > { %v1792_v34 = vpop.f32.mrb[48].mxu1 }
0x10c4   : > { %v1798_v46 = vpack.c.bf16 %v1792_v34, %v1792_v34  ;;  %v2255_v39 = vpop.f32.mrb[49].mxu1 }
0x10c5   : > { %v1795_v40 = vpop.f32.mrb[50].mxu1 }
0x10c6   : > { %v2256_v41 = vpop.f32.mrb[51].mxu1  ;;  %2260 = vmatmul.mubr.msk.bf16.vlgmr.msra.gmra.mrb[52].mxu0 %vm593_vm2, %v1798_v46 }
0x1199   : > { %v1836_v24 = vpop.f32.mrb[52].mxu0 }
0x119a   : > { %v1842_v42 = vadd.f32 %v1836_v24, %v1687_v0  ;;  %v2261_v43 = vpop.f32.mrb[53].mxu0 }
0x119b   : > { %v1839_v44 = vpop.f32.mrb[54].mxu0 }
0x119c   : > { %v1843_v45 = vadd.f32 %v1842_v42, %v2909_v12  ;;  %v2262_v47 = vpop.f32.mrb[55].mxu0 }
0x119e   : > { %1844 = vst.msk [vmem:[%s2913_s19 + $0x8] sm:$0xff] %vm382_vm1, %v1843_v45 }
0x119f   : > { %2443 = shalt.err (!%p2440_p9)
}
0x11a0   : > { %s2444_s27 = scalar_lea.hbm %s2974_s16, 256  ;;  %s2448_s26 = scalar_lea.hbm %s3029_s6, 512 }
0x11a1   : > { %p2445_p1 = scmp.ne.s32.totalorder %s2974_s16, %s2444_s27  ;;  %p2449_p11 = scmp.lt.u32.totalorder %s2974_s16, %s3029_s6 }
0x11a2   : > { %p2450_p2 = scmp.lt.u32.totalorder %s2448_s26, %s2444_s27  ;;  %p2452_p6 = scmp.lt.u32.totalorder %s2444_s27, %s2974_s16 }
0x11a3   : > { %p2446_p0 = pnand %p2445_p1, %p2644_p12 }
0x11a4   : > { %p2451_p4 = por %p2450_p2, %p2449_p11 }
0x11a5   : > { %p2447_p5 = pneg %p2446_p0 }
0x11a6   : > { %p2453_p8 = por %p2452_p6, %p2451_p4 }
0x11a8   : > { %p2454_p10 = pnand %p2453_p8, %p2447_p5 }
0x11aa   : > { %2457 = shalt.err (!%p2454_p10)
}
0x11ab   : > { %s2513_s30 = smov 128   ;;  %s2514_s15 = smov 8  }
0x11ac   : > { %2269 = dma.vmem_to_hbm [thread:$0]  (%p2644_p12), %s2976_s11, 256, %s2974_s16, %s1846_s25, %s2513_s30, %s2513_s30, %s2514_s15  }
0x11ad PF: > { %s1874_s18 = sand.u32 1, %s2488_s21   ;;  %p3044_p13 = scmp.ne.s32.totalorder %s3034_s28, 0 }
0x11ae   : > { %p3045_p3 = scmp.ge.s32.totalorder %s2500_s24, 2  ;;  %s1875_s17 = scalar_lea.sflag [#allocation4], %s1874_s18 }
0x11b0   : > { %p2280_p7 = pnand %p3045_p3, %p3044_p13 }
0x11b2   : > { %2483 = dma.done.wait (!%p2280_p7), %s1875_s17, 256  }
0x11b3   : > { %2485 = vsyncadd (!%p2280_p7), %s1875_s17, 4294967040  ;;  %p20_p9 = scmp.ge.s32.totalorder %s2606_s9, 4   ;;  %s3046_s21 = smov %s2492_s22 }
0x11b4   : > { %s3047_s22 = smov %s2496_s23  ;;  %s3048_s23 = smov %s2640_s13 }
0x11b5   : > { %s3049_s24 = smov %s2606_s9  ;;  %22 = sbr.rel (!%p20_p9) target bundleno = 6 (0x6), region = 105 }
0x11bc   :  { %1880 = vsyncpa [#allocation3], 1 }
0x11bd   :  { %1882 = vsyncpa [#allocation3 + $0x1], 1 }
0x11be   :  { %1883 = vsyncpa [#allocation6], 1 }
0x11bf   :  { %1884 = vsyncpa [#allocation4], 1 }
0x11c0   :  { %1886 = vsyncpa [#allocation4 + $0x1], 1 }

</bundles_post_ra>
